<compile_context>
chip_gen: v7x
topology: tpu7x:2x2x1
jax: 0.10.0
libtpu: 0.0.40
codegen_flags: <defaults>
</compile_context>

<pallas_src>
import jax
import jax.numpy as jnp
from jax import lax
from jax.experimental import pallas as pl
from jax.experimental.pallas import tpu as pltpu

LANE = 128
# Set to jnp.bfloat16 on v6e/v7x for ~4x MXU rate (loosen the check to ~2e-2 if so).
MATMUL_OPERAND_DTYPE = jnp.float32


def _round_up(x, m):
    return (x + m - 1) // m * m


def yolo_head_kernel(x_ref, w1_ref, s_ref, b_ref, w2t_ref, b2_ref, out_ref):
    """One (batch, row-tile) step of the fused YOLO head.

    x_ref   : (1, 1, TH+2, W+2, Cin)  halo row-tile of the padded NHWC input
    w1_ref  : (9*Cin, Cmid_p)         im2col-ordered 3x3 weights, Cmid zero-padded to 128
    s_ref   : (1, Cmid_p)             folded BN scale (zero in padded lanes)
    b_ref   : (1, Cmid_p)             folded BN bias  (zero in padded lanes)
    w2t_ref : (Cout, Cmid_p)          1x1 weights, transposed, Cmid zero-padded
    b2_ref  : (Cout, 1)               1x1 bias as a column vector
    out_ref : (1, Cout, TH*W)         lane-dense output tile (channels-major, flat spatial)
    """
    _, _, thp2, wp, cin = x_ref.shape
    th, w = thp2 - 2, wp - 2
    m = th * w

    x = x_ref[0, 0]                                          # (TH+2, W+2, Cin)

    # im2col: 9 shifted taps concatenated on the channel (lane) axis -> K = 9*Cin.
    # (The dx shift could alternatively be realised with pltpu.roll on the sublane
    #  axis; the single concat keeps the conv as one clean MXU matmul.)
    taps = [x[dy:dy + th, dx:dx + w, :] for dy in range(3) for dx in range(3)]
    patches = jnp.concatenate(taps, axis=-1).reshape(m, 9 * cin)      # (M, K)

    # 3x3 conv as a single MXU matmul: (M, 9*Cin) @ (9*Cin, Cmid_p), f32 accumulate.
    y = jnp.dot(patches.astype(MATMUL_OPERAND_DTYPE),
                w1_ref[...].astype(MATMUL_OPERAND_DTYPE),
                preferred_element_type=jnp.float32)                   # (M, Cmid_p)

    # Folded BatchNorm + LeakyReLU(0.1) on full 128-lane vregs (kept in f32 on the VPU).
    y = y * s_ref[...] + b_ref[...]
    y = jnp.where(y > 0, y, 0.1 * y)

    # 1x1 conv, emitted directly in (Cout, M) orientation so the store is lane-dense:
    #   out[c, m] = sum_k w2t[c, k] * y[m, k]
    # (rhs-transposed dot -- same native MXU pattern as q @ k.T; no explicit transpose.)
    out = lax.dot_general(
        w2t_ref[...].astype(MATMUL_OPERAND_DTYPE),
        y.astype(MATMUL_OPERAND_DTYPE),
        dimension_numbers=(((1,), (1,)), ((), ())),
        preferred_element_type=jnp.float32)                           # (Cout, M)
    out = out + b2_ref[...]
    out_ref[...] = out[None].astype(out_ref.dtype)                    # (1, Cout, M)


def _pick_row_tile(H, W, Cin, Cmid_p, Cout, vmem_budget_bytes=8 << 20):
    """Largest row tile TH that divides H, keeps TH*W a multiple of 128 (lane-dense
    output stores) and whose double-buffered tiles fit the VMEM budget. The budget
    is sized conservatively for v7x (64 MiB physical / ~32 MiB scoped VMEM; every
    BlockSpec operand is double-buffered)."""
    candidates = [t for t in range(1, H + 1) if H % t == 0 and (t * W) % LANE == 0]
    if not candidates:
        return H                               # full-height tile is always legal
    for th in sorted(candidates, reverse=True):
        in_tile = (th + 2) * _round_up(W + 2, 8) * _round_up(Cin, LANE) * 4
        mid_tile = 2 * th * W * Cmid_p * 4     # im2col + conv activations (f32)
        out_tile = _round_up(Cout, 8) * th * W * 4
        if 2 * (in_tile + out_tile) + mid_tile <= vmem_budget_bytes:
            return th
    return candidates[0]


def yolo_head_forward(x_nchw, params, *, row_tile=None):
    """x_nchw: (N, Cin, H, W) float32 -> (N, Cout, H, W) float32."""
    w1, gamma, beta, run_mean, run_var, w2, b2 = params
    eps = 1e-5

    N, Cin, H, W = x_nchw.shape
    Cmid = w1.shape[-1]
    Cout = w2.shape[-1]
    Cmid_p = _round_up(Cmid, LANE)

    if row_tile is None:
        row_tile = _pick_row_tile(H, W, Cin, Cmid_p, Cout)
    TH = row_tile
    assert H % TH == 0, "row_tile must divide H"
    assert (TH * W) % LANE == 0 or TH == H, "row_tile*W must be a multiple of 128"
    n_t = H // TH

    # Fold BN into scale/bias (inference form).
    s = gamma / jnp.sqrt(run_var + eps)                        # (Cmid,)
    b = beta - run_mean * s                                    # (Cmid,)

    # Zero-pad the mid channel dim to a lane multiple: full-lane vregs in the kernel,
    # and the padded lanes contribute exactly zero to the 1x1 conv.
    w1_p = jnp.pad(w1.reshape(9 * Cin, Cmid), ((0, 0), (0, Cmid_p - Cmid)))
    s_p = jnp.pad(s, (0, Cmid_p - Cmid)).reshape(1, Cmid_p)
    b_p = jnp.pad(b, (0, Cmid_p - Cmid)).reshape(1, Cmid_p)
    w2t_p = jnp.pad(w2.T, ((0, 0), (0, Cmid_p - Cmid)))        # (Cout, Cmid_p)
    b2_col = b2.reshape(Cout, 1)

    # NCHW -> NHWC, zero pad for the "same" 3x3 conv, and cut overlapping row tiles
    # with a 1-row halo on each side -- done as one indexing chain so XLA keeps it
    # to roughly a single rewrite of the input (instead of transpose + pad copies).
    # TODO(synk): a zero-copy alternative is an element-offset halo BlockSpec
    # (pl.Element) on the padded input instead of materialising x_tiles.
    x_nhwc = jnp.transpose(x_nchw, (0, 2, 3, 1))               # (N, H, W, Cin)
    xpad = jnp.pad(x_nhwc, ((0, 0), (1, 1), (1, 1), (0, 0)))   # (N, H+2, W+2, Cin)
    row_ids = TH * jnp.arange(n_t)[:, None] + jnp.arange(TH + 2)[None, :]
    x_tiles = xpad[:, row_ids]                                 # (N, n_t, TH+2, W+2, Cin)

    flops = 2 * N * H * W * (9 * Cin * Cmid + Cmid * Cout)
    bytes_accessed = (x_nchw.size + w1.size + w2.size + N * Cout * H * W) * 4

    out_flat = pl.pallas_call(
        yolo_head_kernel,
        out_shape=jax.ShapeDtypeStruct((N, Cout, H * W), jnp.float32),
        grid=(N, n_t),
        in_specs=[
            pl.BlockSpec((1, 1, TH + 2, W + 2, Cin), lambda n, i: (n, i, 0, 0, 0)),
            pl.BlockSpec((9 * Cin, Cmid_p), lambda n, i: (0, 0)),
            pl.BlockSpec((1, Cmid_p), lambda n, i: (0, 0)),
            pl.BlockSpec((1, Cmid_p), lambda n, i: (0, 0)),
            pl.BlockSpec((Cout, Cmid_p), lambda n, i: (0, 0)),
            pl.BlockSpec((Cout, 1), lambda n, i: (0, 0)),
        ],
        out_specs=pl.BlockSpec((1, Cout, TH * W), lambda n, i: (n, 0, i)),
        compiler_params=pltpu.CompilerParams(
            dimension_semantics=("parallel", "parallel"),
            vmem_limit_bytes=32 * 1024 * 1024),
        cost_estimate=pl.CostEstimate(
            flops=flops, transcendentals=0, bytes_accessed=bytes_accessed),
    )(x_tiles, w1_p, s_p, b_p, w2t_p, b2_col)

    # (N, Cout, H*W) -> (N, Cout, H, W): a pure reshape, no output transpose needed.
    return out_flat.reshape(N, Cout, H, W)


def reference_forward(x_nchw, params):
    """Pure-JAX reference (same math, XLA convs) for sanity checking."""
    w1, gamma, beta, run_mean, run_var, w2, b2 = params
    eps = 1e-5
    w1_oihw = jnp.transpose(w1, (3, 2, 0, 1))
    y = lax.conv_general_dilated(
        x_nchw, w1_oihw, window_strides=(1, 1), padding="SAME",
        dimension_numbers=("NCHW", "OIHW", "NCHW"))
    s = (gamma / jnp.sqrt(run_var + eps)).reshape(1, -1, 1, 1)
    b = (beta - run_mean * gamma / jnp.sqrt(run_var + eps)).reshape(1, -1, 1, 1)
    y = y * s + b
    y = jnp.where(y > 0, y, 0.1 * y)
    w2_oihw = jnp.transpose(w2, (1, 0))[:, :, None, None]      # (Cout, Cmid, 1, 1)
    out = lax.conv_general_dilated(
        y, w2_oihw, window_strides=(1, 1), padding="VALID",
        dimension_numbers=("NCHW", "OIHW", "NCHW"))
    return out + b2.reshape(1, -1, 1, 1)


def init_params(key, in_channels, channels):
    """Deterministic synthetic parameters matching the nn.Module shapes."""
    cmid, cout = channels
    k1, k2, k3, k4, k5, k6 = jax.random.split(key, 6)
    # Conv2d(in, cmid, 3, bias=False): torch (cmid, in, 3, 3) -> ours (3, 3, in, cmid)
    w1 = jax.random.normal(k1, (3, 3, in_channels, cmid), jnp.float32) * 0.1
    # BatchNorm2d(cmid)
    gamma = 1.0 + 0.1 * jax.random.normal(k2, (cmid,), jnp.float32)
    beta = 0.1 * jax.random.normal(k3, (cmid,), jnp.float32)
    run_mean = 0.1 * jax.random.normal(k4, (cmid,), jnp.float32)
    run_var = jnp.abs(1.0 + 0.1 * jax.random.normal(k5, (cmid,), jnp.float32))
    # Conv2d(cmid, cout, 1): torch (cout, cmid, 1, 1) -> ours (cmid, cout)
    w2 = jax.random.normal(k6, (cmid, cout), jnp.float32) * 0.1
    b2 = jnp.linspace(-0.05, 0.05, cout, dtype=jnp.float32)
    return (w1, gamma, beta, run_mean, run_var, w2, b2)


if __name__ == "__main__":
    key = jax.random.PRNGKey(0)
    kx, kp = jax.random.split(key)

    # Small shapes consistent with the module: YOLOHead(channels=[8, 18], in_channels=4)
    N, Cin, H, W = 2, 4, 16, 16
    channels = [8, 18]

    x = jax.random.normal(kx, (N, Cin, H, W), jnp.float32)
    params = init_params(kp, Cin, channels)

    ref = jax.block_until_ready(reference_forward(x, params))

    # Run once with the auto-picked row tile and once with an explicit 2-tile grid
    # (grid = (2, 2)) to exercise the halo/tiling path as well.
    for row_tile in (None, 8):
        out = jax.block_until_ready(yolo_head_forward(x, params, row_tile=row_tile))
        assert out.shape == (N, channels[1], H, W), out.shape
        err = float(jnp.max(jnp.abs(out - ref)))
        assert err < 1e-3, (row_tile, err)

    print("KERNEL_OK")
</pallas_src>

<mosaic_0001>
module attributes {stable_mosaic.version = 11 : i64} {
  func.func @yolo_head_kernel(%arg0: i32, %arg1: i32, %arg2: memref<1x1x18x18x4xf32, #tpu.memory_space<vmem>>, %arg3: memref<36x128xf32, #tpu.memory_space<vmem>>, %arg4: memref<1x128xf32, #tpu.memory_space<vmem>>, %arg5: memref<1x128xf32, #tpu.memory_space<vmem>>, %arg6: memref<18x128xf32, #tpu.memory_space<vmem>>, %arg7: memref<18x1xf32, #tpu.memory_space<vmem>>, %arg8: memref<1x18x256xf32, #tpu.memory_space<vmem>>) attributes {dimension_semantics = [#tpu.dimension_semantics<parallel>, #tpu.dimension_semantics<parallel>], iteration_bounds = array<i64: 2, 1>, scalar_prefetch = 0 : i64, scratch_operands = 0 : i64, tpu.core_type = #tpu.core_type<tc>, window_params = [{transform_indices = @transform_0, window_bounds = array<i64: 1, 1, 18, 18, 4>}, {pipeline_mode = #tpu.pipeline_mode<synchronous>, transform_indices = @transform_1, window_bounds = array<i64: 36, 128>}, {pipeline_mode = #tpu.pipeline_mode<synchronous>, transform_indices = @transform_2, window_bounds = array<i64: 1, 128>}, {pipeline_mode = #tpu.pipeline_mode<synchronous>, transform_indices = @transform_3, window_bounds = array<i64: 1, 128>}, {pipeline_mode = #tpu.pipeline_mode<synchronous>, transform_indices = @transform_4, window_bounds = array<i64: 18, 128>}, {pipeline_mode = #tpu.pipeline_mode<synchronous>, transform_indices = @transform_5, window_bounds = array<i64: 18, 1>}, {transform_indices = @transform_6, window_bounds = array<i64: 1, 18, 256>}]} {
    %c0 = arith.constant 0 : index
    %c0_0 = arith.constant 0 : index
    %c0_1 = arith.constant 0 : index
    %c0_2 = arith.constant 0 : index
    %c0_3 = arith.constant 0 : index
    %0 = vector.load %arg2[%c0, %c0_0, %c0_1, %c0_2, %c0_3] : memref<1x1x18x18x4xf32, #tpu.memory_space<vmem>>, vector<1x1x18x18x4xf32>
    %1 = vector.shape_cast %0 : vector<1x1x18x18x4xf32> to vector<18x18x4xf32>
    %2 = vector.extract_strided_slice %1 {offsets = [0, 0, 0], sizes = [16, 16, 4], strides = [1, 1, 1]} : vector<18x18x4xf32> to vector<16x16x4xf32>
    %3 = vector.extract_strided_slice %1 {offsets = [0, 1, 0], sizes = [16, 16, 4], strides = [1, 1, 1]} : vector<18x18x4xf32> to vector<16x16x4xf32>
    %4 = vector.extract_strided_slice %1 {offsets = [0, 2, 0], sizes = [16, 16, 4], strides = [1, 1, 1]} : vector<18x18x4xf32> to vector<16x16x4xf32>
    %5 = vector.extract_strided_slice %1 {offsets = [1, 0, 0], sizes = [16, 16, 4], strides = [1, 1, 1]} : vector<18x18x4xf32> to vector<16x16x4xf32>
    %6 = vector.extract_strided_slice %1 {offsets = [1, 1, 0], sizes = [16, 16, 4], strides = [1, 1, 1]} : vector<18x18x4xf32> to vector<16x16x4xf32>
    %7 = vector.extract_strided_slice %1 {offsets = [1, 2, 0], sizes = [16, 16, 4], strides = [1, 1, 1]} : vector<18x18x4xf32> to vector<16x16x4xf32>
    %8 = vector.extract_strided_slice %1 {offsets = [2, 0, 0], sizes = [16, 16, 4], strides = [1, 1, 1]} : vector<18x18x4xf32> to vector<16x16x4xf32>
    %9 = vector.extract_strided_slice %1 {offsets = [2, 1, 0], sizes = [16, 16, 4], strides = [1, 1, 1]} : vector<18x18x4xf32> to vector<16x16x4xf32>
    %10 = vector.extract_strided_slice %1 {offsets = [2, 2, 0], sizes = [16, 16, 4], strides = [1, 1, 1]} : vector<18x18x4xf32> to vector<16x16x4xf32>
    %11 = tpu.concatenate %2, %3, %4, %5, %6, %7, %8, %9, %10 in 2 : vector<16x16x4xf32>, vector<16x16x4xf32>, vector<16x16x4xf32>, vector<16x16x4xf32>, vector<16x16x4xf32>, vector<16x16x4xf32>, vector<16x16x4xf32>, vector<16x16x4xf32>, vector<16x16x4xf32> -> vector<16x16x36xf32>
    %12 = vector.shape_cast %11 : vector<16x16x36xf32> to vector<256x36xf32>
    %c0_4 = arith.constant 0 : index
    %c0_5 = arith.constant 0 : index
    %13 = vector.load %arg3[%c0_4, %c0_5] : memref<36x128xf32, #tpu.memory_space<vmem>>, vector<36x128xf32>
    %cst = arith.constant dense<0.000000e+00> : vector<256x128xf32>
    %14 = tpu.matmul %12, %13, %cst {dimension_numbers = #tpu.dot_dimension_numbers<[1], [0], [0], [1], [0, 0, 1, 1], [], []>} : vector<256x36xf32>, vector<36x128xf32>, vector<256x128xf32> -> vector<256x128xf32>
    %c0_6 = arith.constant 0 : index
    %c0_7 = arith.constant 0 : index
    %15 = vector.load %arg4[%c0_6, %c0_7] : memref<1x128xf32, #tpu.memory_space<vmem>>, vector<1x128xf32>
    %16 = vector.broadcast %15 : vector<1x128xf32> to vector<256x128xf32>
    %17 = arith.mulf %14, %16 : vector<256x128xf32>
    %c0_8 = arith.constant 0 : index
    %c0_9 = arith.constant 0 : index
    %18 = vector.load %arg5[%c0_8, %c0_9] : memref<1x128xf32, #tpu.memory_space<vmem>>, vector<1x128xf32>
    %19 = vector.broadcast %18 : vector<1x128xf32> to vector<256x128xf32>
    %20 = arith.addf %17, %19 : vector<256x128xf32>
    %cst_10 = arith.constant 0.000000e+00 : f32
    %21 = vector.broadcast %cst_10 : f32 to vector<256x128xf32>
    %22 = arith.cmpf ogt, %20, %21 : vector<256x128xf32>
    %cst_11 = arith.constant 1.000000e-01 : f32
    %23 = vector.broadcast %cst_11 : f32 to vector<256x128xf32>
    %24 = arith.mulf %23, %20 : vector<256x128xf32>
    %25 = arith.select %22, %20, %24 : vector<256x128xi1>, vector<256x128xf32>
    %c0_12 = arith.constant 0 : index
    %c0_13 = arith.constant 0 : index
    %26 = vector.load %arg6[%c0_12, %c0_13] : memref<18x128xf32, #tpu.memory_space<vmem>>, vector<18x128xf32>
    %cst_14 = arith.constant dense<0.000000e+00> : vector<18x256xf32>
    %27 = tpu.matmul %26, %25, %cst_14 {dimension_numbers = #tpu.dot_dimension_numbers<[1], [1], [0], [0], [0, 0, 1, 0], [], []>} : vector<18x128xf32>, vector<256x128xf32>, vector<18x256xf32> -> vector<18x256xf32>
    %c0_15 = arith.constant 0 : index
    %c0_16 = arith.constant 0 : index
    %28 = vector.load %arg7[%c0_15, %c0_16] : memref<18x1xf32, #tpu.memory_space<vmem>>, vector<18x1xf32>
    %29 = vector.broadcast %28 : vector<18x1xf32> to vector<18x256xf32>
    %30 = arith.addf %27, %29 : vector<18x256xf32>
    %31 = vector.shape_cast %30 : vector<18x256xf32> to vector<1x18x256xf32>
    %c0_17 = arith.constant 0 : index
    %c0_18 = arith.constant 0 : index
    %c0_19 = arith.constant 0 : index
    %32 = vector.load %arg8[%c0_17, %c0_18, %c0_19] : memref<1x18x256xf32, #tpu.memory_space<vmem>>, vector<1x18x256xf32>
    tpu.vector_store %arg8[%c0_17, %c0_18, %c0_19], %31 {strides = array<i32>} : memref<1x18x256xf32, #tpu.memory_space<vmem>>, vector<1x18x256xf32>,
    return
  }
  func.func @transform_0(%arg0: i32, %arg1: i32) -> (i32, i32, i32, i32, i32) {
    %c0_i32 = arith.constant 0 : i32
    %c0_i32_0 = arith.constant 0 : i32
    %c0_i32_1 = arith.constant 0 : i32
    %c0_i32_2 = arith.constant 0 : i32
    return %arg0, %arg1, %c0_i32, %c0_i32_0, %c0_i32_1 : i32, i32, i32, i32, i32
  }
  func.func @transform_1(%arg0: i32, %arg1: i32) -> (i32, i32) {
    %c0_i32 = arith.constant 0 : i32
    %c0_i32_0 = arith.constant 0 : i32
    %c0_i32_1 = arith.constant 0 : i32
    return %c0_i32, %c0_i32_0 : i32, i32
  }
  func.func @transform_2(%arg0: i32, %arg1: i32) -> (i32, i32) {
    %c0_i32 = arith.constant 0 : i32
    %c0_i32_0 = arith.constant 0 : i32
    %c0_i32_1 = arith.constant 0 : i32
    return %c0_i32, %c0_i32_0 : i32, i32
  }
  func.func @transform_3(%arg0: i32, %arg1: i32) -> (i32, i32) {
    %c0_i32 = arith.constant 0 : i32
    %c0_i32_0 = arith.constant 0 : i32
    %c0_i32_1 = arith.constant 0 : i32
    return %c0_i32, %c0_i32_0 : i32, i32
  }
  func.func @transform_4(%arg0: i32, %arg1: i32) -> (i32, i32) {
    %c0_i32 = arith.constant 0 : i32
    %c0_i32_0 = arith.constant 0 : i32
    %c0_i32_1 = arith.constant 0 : i32
    return %c0_i32, %c0_i32_0 : i32, i32
  }
  func.func @transform_5(%arg0: i32, %arg1: i32) -> (i32, i32) {
    %c0_i32 = arith.constant 0 : i32
    %c0_i32_0 = arith.constant 0 : i32
    %c0_i32_1 = arith.constant 0 : i32
    return %c0_i32, %c0_i32_0 : i32, i32
  }
  func.func @transform_6(%arg0: i32, %arg1: i32) -> (i32, i32, i32) {
    %c0_i32 = arith.constant 0 : i32
    %c0_i32_0 = arith.constant 0 : i32
    return %arg0, %c0_i32, %arg1 : i32, i32, i32
  }
}

</mosaic_0001>

<bundles_post_ra>
// kernel: tpu_custom_call.1
= control target key start
LH: loop header
LB: loop body
LE: loop exit
PB: predicated region body
PF: predicated region fallthrough
CT: control target
= control target key end

     0   :  { %s2640_s21 = smov 0   ;;  %s2642_s22 = smov 0   ;;  %s4082_s0 = inlined_call_operand.vmem [shape: f32[2,1,18,18,4], index: 0, kind: input, shape index: {}]   ;;  %s4083_s1 = inlined_call_operand.vmem [shape: f32[36,128], index: 1, kind: input, shape index: {}]   ;;  %s4084_s2 = inlined_call_operand.vmem [shape: f32[1,128], index: 2, kind: input, shape index: {}]   ;;  %s4085_s3 = inlined_call_operand.vmem [shape: f32[1,128], index: 3, kind: input, shape index: {}]   ;;  %s4086_s4 = inlined_call_operand.vmem [shape: f32[18,128], index: 4, kind: input, shape index: {}]   ;;  %s4087_s5 = inlined_call_operand.vmem [shape: f32[18,1], index: 5, kind: input, shape index: {}]   ;;  %s4088_s6 = inlined_call_operand.vmem [shape: f32[2,18,256], index: 6, kind: output, shape index: {}]  }
   0x1   :  { %s2644_s23 = smov 0  }
   0x2 LB: > { %s28_s24 = sadd.s32 1, %s2590_s22  ;;  %p2320_p0 = scmp.ge.s32.totalorder %s2594_s23, 1  ;;  %s2594_s23 = sphi %s2644_s23, %s16_s23   ;;  %s2590_s22 = sphi %s2642_s22, %s4090_s22   ;;  %s2586_s21 = sphi %s2640_s21, %s4089_s21  }
   0x3   : > { %p30_p1 = scmp.ge.s32.totalorder %s28_s24, 2  ;;  %p232_p2 = scmp.lt.s32.totalorder %s2594_s23, 3 }
   0x5   : > { %s4092_s24 = smov (%p30_p1, %s28_s24), 0  ;;  %p233_p3 = pnand %p2320_p0, %p232_p2 }
   0x6   : > { %p270_p4 = scmp.lt.s32.totalorder (!%p233_p3), %s2586_s21, 1  ;;  %vm568_vm0 = vcmask (!%p233_p3), 1045504   ;;  %s2596_s29 = smov (!%p233_p3), 12   ;;  %vm391_vm1 = vcmask (!%p233_p3), 1046528   ;;  %v1611_v28 = vld [vmem:[%s4083_s1] sm:$0xff] (!%p233_p3)  ;;  %v1612_v29 = vld [vmem:[%s4083_s1 + $0x8] sm:$0xff] (!%p233_p3) }
   0x7   : > { %236 = sbr.rel (%p233_p3) target bundleno = 1098 (0x44a), region = 44  ;;  %s2597_s30 = smov (!%p233_p3), 8   ;;  %v2493_v30 = vpack.c.bf16 (!%p233_p3), %v1612_v29, %v1611_v28  ;;  %v1613_v33 = vld [vmem:[%s4083_s1 + $0x10] sm:$0xff] (!%p233_p3)  ;;  %v1614_v34 = vld [vmem:[%s4083_s1 + $0x18] sm:$0xff] (!%p233_p3)  ;;  %v1615_v38 = vld [vmem:[%s4083_s1 + $0x20] sm:$0xf] (!%p233_p3) }
   0x8   : > { %s2598_s7 = smov (!%p233_p3), 4   ;;  %s2599_s8 = smov (!%p233_p3), 16   ;;  %v2497_v36 = vpack.c.bf16 (!%p233_p3), %v1614_v34, %v1613_v33  ;;  %vm1713_vm2 = vcmask (!%p233_p3), 1043456   ;;  %vm1347_vm3 = vcmask (!%p233_p3), 31744   ;;  %vm1380_vm4 = vcmask (!%p233_p3), 64512  }
   0x9   : > { %s2600_s9 = smov (!%p233_p3), 20   ;;  %s2601_s14 = smov (!%p233_p3), 24   ;;  %2494 = vmatprep.subr.bf16.mxu0 (!%p233_p3), %v2493_v30  ;;  %vm1413_vm5 = vcmask (!%p233_p3), 97280   ;;  %vm1446_vm6 = vcmask (!%p233_p3), 130048   ;;  %vm1479_vm7 = vcmask (!%p233_p3), 162816   ;;  %vm1512_vm8 = vcmask (!%p233_p3), 195584  }
   0xa   : > { %2496 = vmatpush3.bf16.msra.mxu0 (!%p233_p3), %v2493_v30  ;;  %s2602_s19 = smov (!%p233_p3), 28   ;;  %s2603_s26 = smov (!%p233_p3), 32   ;;  %vm1545_vm9 = vcmask (!%p233_p3), 228352   ;;  %vm1578_vm10 = vcmask (!%p233_p3), 261120   ;;  %vm1616_vm11 = vcmask (!%p233_p3), 293888  }
   0xb   : > { %2498 = vmatprep.subr.bf16.mxu0 (!%p233_p3), %v2497_v36 }
   0xe   : > { %s4094_s21 = smov (!%p270_p4, %s2586_s21), 1  ;;  %2500 = vmatpush3.bf16.msra.mxu0 %v2497_v36 }
   0xf   : > { %s2533_s25 = smul.u32 432, %s4094_s21  ;;  %2443 = vmatprep.subr.msk.mxu0 %vm1713_vm2, %v1615_v38 }
  0x10   : > { %s2534_s27 = smul.u32 48, %s4094_s21 }
  0x11   : > { %s2664_s28 = scalar_lea.vmem %s4082_s0, %s2533_s25 }
  0x12   : > { %v2667_v0 = vld [vmem:[%s2664_s28 + $0x20] sm:$0xff]  ;;  %v2670_v1 = vld [vmem:[%s2664_s28 + $0x18] sm:$0xff]  ;;  %v2680_v3 = vld [vmem:[%s2664_s28 + $0x8] sm:$0xff]  ;;  %2444 = vmatpush3.msk.msra.mxu0 %vm1713_vm2, %v1615_v38  ;;  %s287_s12 = scalar_lea.vmem %s4088_s6, %s2534_s27 }
  0x13   : > { %v2673_v2 = vld [vmem:[%s2664_s28] sm:$0xff]  ;;  %749 = vrot.lane.b32.xlu1 %v2667_v0, %s2596_s29  ;;  %747 = vrot.lane.b32.xlu0 %v2670_v1, %s2596_s29  ;;  %v291_v6 = vld [vmem:[%s2664_s28 + $0x10] sm:$0x3]  ;;  %v570_v7 = vrot.slane %v2680_v3, 2  ;;  %v393_v8 = vrot.slane %v2680_v3, 1  ;;  %v397_v15 = vrot.slane %v2670_v1, 1 }
  0x14   : > { %v569_v4 = vrot.slane %v2673_v2, 2  ;;  %v392_v5 = vrot.slane %v2673_v2, 1  ;;  %v572_v9 = vrot.slane %v291_v6, 2  ;;  %v395_v10 = vrot.slane %v291_v6, 1  ;;  %v294_v17 = vld [vmem:[%s2664_s28 + $0x28] sm:$0x3] }
  0x15   : > { %v398_v16 = vrot.slane %v2667_v0, 1  ;;  %v574_v19 = vrot.slane %v2670_v1, 2  ;;  %v575_v20 = vrot.slane %v2667_v0, 2  ;;  %v400_v21 = vrot.slane %v294_v17, 1  ;;  %v2710_v25 = vld [vmem:[%s2664_s28 + $0x30] sm:$0xff]  ;;  %v2714_v27 = vld [vmem:[%s2664_s28 + $0x38] sm:$0xff] }
  0x16   : > { %v571_v11 = vsel %vm568_vm0, %v569_v4, %v570_v7  ;;  %v394_v12 = vsel %vm391_vm1, %v392_v5, %v393_v8  ;;  %v573_v13 = vsel %vm568_vm0, %v570_v7, %v572_v9  ;;  %v396_v14 = vsel %vm391_vm1, %v393_v8, %v395_v10  ;;  %v297_v37 = vld [vmem:[%s2664_s28 + $0x40] sm:$0x3]  ;;  %v2761_v46 = vld [vmem:[%s2664_s28 + $0x48] sm:$0xff]  ;;  %v2764_v47 = vld [vmem:[%s2664_s28 + $0x50] sm:$0xff] }
  0x17   : > { %649 = vrot.lane.b32.xlu1 %v571_v11, %s2597_s30  ;;  %472 = vrot.lane.b32.xlu0 %v394_v12, %s2598_s7  ;;  %v399_v18 = vsel %vm391_vm1, %v397_v15, %v398_v16  ;;  %v576_v22 = vsel %vm568_vm0, %v574_v19, %v575_v20  ;;  %v401_v23 = vsel %vm391_vm1, %v398_v16, %v400_v21  ;;  %v577_v24 = vrot.slane %v294_v17, 2  ;;  %v300_v51 = vld [vmem:[%s2664_s28 + $0x58] sm:$0x3]  ;;  %v2796_v59 = vld [vmem:[%s2664_s28 + $0x60] sm:$0xff] }
  0x18   : > { %v402_v31 = vrot.slane %v2710_v25, 1  ;;  %v403_v32 = vrot.slane %v2714_v27, 1  ;;  %v579_v39 = vrot.slane %v2710_v25, 2  ;;  %v580_v40 = vrot.slane %v2714_v27, 2  ;;  %v2799_v60 = vld [vmem:[%s2664_s28 + $0x68] sm:$0xff]  ;;  %v2836_v17 = vld [vmem:[%s2664_s28 + $0x80] sm:$0xff] }
  0x19   : > { %v578_v26 = vsel %vm568_vm0, %v575_v20, %v577_v24  ;;  %v405_v41 = vrot.slane %v297_v37, 1  ;;  %v582_v44 = vrot.slane %v297_v37, 2  ;;  %v407_v48 = vrot.slane %v2761_v46, 1  ;;  %v303_v4 = vld [vmem:[%s2664_s28 + $0x70] sm:$0x3] }
  0x1a   : > { %v404_v35 = vsel %vm391_vm1, %v402_v31, %v403_v32  ;;  %v581_v42 = vsel %vm568_vm0, %v579_v39, %v580_v40  ;;  %v408_v49 = vrot.slane %v2764_v47, 1  ;;  %v584_v52 = vrot.slane %v2761_v46, 2 }
  0x1b   : > { %651 = vrot.lane.b32.xlu1 %v573_v13, %s2597_s30  ;;  %474 = vrot.lane.b32.xlu0 %v396_v14, %s2598_s7  ;;  %v406_v43 = vsel %vm391_vm1, %v403_v32, %v405_v41  ;;  %v583_v45 = vsel %vm568_vm0, %v580_v40, %v582_v44  ;;  %v585_v53 = vrot.slane %v2764_v47, 2  ;;  %v410_v54 = vrot.slane %v300_v51, 1  ;;  %v2833_v14 = vld [vmem:[%s2664_s28 + $0x78] sm:$0xff] }
  0x1c   : > { %v409_v50 = vsel %vm391_vm1, %v407_v48, %v408_v49  ;;  %v587_v57 = vrot.slane %v300_v51, 2  ;;  %v412_v61 = vrot.slane %v2796_v59, 1  ;;  %v413_v62 = vrot.slane %v2799_v60, 1 }
  0x1d   : > { %v586_v55 = vsel %vm568_vm0, %v584_v52, %v585_v53  ;;  %v411_v56 = vsel %vm391_vm1, %v408_v49, %v410_v54  ;;  %v589_v5 = vrot.slane %v2796_v59, 2  ;;  %v590_v6 = vrot.slane %v2799_v60, 2  ;;  %v2883_v49 = vld [vmem:[%s2664_s28 + $0x90] sm:$0xff]  ;;  %v2891_v52 = vld [vmem:[%s2664_s28 + $0x98] sm:$0xff] }
  0x1e   : > { %v588_v58 = vsel %vm568_vm0, %v585_v53, %v587_v57  ;;  %v414_v63 = vsel %vm391_vm1, %v412_v61, %v413_v62  ;;  %v415_v7 = vrot.slane %v303_v4, 1  ;;  %v592_v10 = vrot.slane %v303_v4, 2 }
  0x1f   : > { %476 = vrot.lane.b32.xlu1 %v399_v18, %s2598_s7  ;;  %849 = vrot.lane.b32.xlu0 %v399_v18, %s2599_s8  ;;  %v591_v8 = vsel %vm568_vm0, %v589_v5, %v590_v6  ;;  %v417_v18 = vrot.slane %v2833_v14, 1  ;;  %v418_v19 = vrot.slane %v2836_v17, 1  ;;  %v594_v28 = vrot.slane %v2833_v14, 2 }
  0x20   : > { %v416_v9 = vsel %vm391_vm1, %v413_v62, %v415_v7  ;;  %v593_v11 = vsel %vm568_vm0, %v590_v6, %v592_v10  ;;  %v595_v29 = vrot.slane %v2836_v17, 2  ;;  %v422_v57 = vrot.slane %v2883_v49, 1 }
  0x22   : > { %v596_v33 = vsel %vm568_vm0, %v594_v28, %v595_v29 }
  0x23   : > { %950 = vrot.lane.b32.xlu1 %v576_v22, %s2600_s9  ;;  %851 = vrot.lane.b32.xlu0 %v401_v23, %s2599_s8 }
  0x27   : > { %653 = vrot.lane.b32.xlu1 %v576_v22, %s2597_s30  ;;  %478 = vrot.lane.b32.xlu0 %v401_v23, %s2598_s7  ;;  %v419_v22 = vsel %vm391_vm1, %v417_v18, %v418_v19 }
  0x2b   : > { %1048 = vrot.lane.b32.xlu1 %v2710_v25, %s2601_s14  ;;  %952 = vrot.lane.b32.xlu0 %v578_v26, %s2600_s9 }
  0x2f   : > { %751 = vrot.lane.b32.xlu1 %v2710_v25, %s2596_s29  ;;  %655 = vrot.lane.b32.xlu0 %v578_v26, %s2597_s30  ;;  %v306_v26 = vld [vmem:[%s2664_s28 + $0x88] sm:$0x3] }
  0x30   : > { %v420_v30 = vrot.slane %v306_v26, 1  ;;  %v597_v37 = vrot.slane %v306_v26, 2 }
  0x32   : > { %v421_v34 = vsel %vm391_vm1, %v418_v19, %v420_v30  ;;  %v598_v40 = vsel %vm568_vm0, %v595_v29, %v597_v37 }
  0x33   : > { %1150 = vrot.lane.b32.xlu1 %v404_v35, %s2602_s19  ;;  %1050 = vrot.lane.b32.xlu0 %v2714_v27, %s2601_s14 }
  0x37   : > { %853 = vrot.lane.b32.xlu1 %v404_v35, %s2599_s8  ;;  %753 = vrot.lane.b32.xlu0 %v2714_v27, %s2596_s29 }
  0x3b   : > { %1251 = vrot.lane.b32.xlu1 %v581_v42, %s2603_s26  ;;  %1152 = vrot.lane.b32.xlu0 %v406_v43, %s2602_s19 }
  0x3f   : > { %855 = vrot.lane.b32.xlu1 %v406_v43, %s2599_s8  ;;  %480 = vrot.lane.b32.xlu0 %v404_v35, %s2598_s7 }
  0x43   : > { %1253 = vrot.lane.b32.xlu1 %v583_v45, %s2603_s26  ;;  %954 = vrot.lane.b32.xlu0 %v581_v42, %s2600_s9 }
  0x47   : > { %657 = vrot.lane.b32.xlu1 %v581_v42, %s2597_s30  ;;  %482 = vrot.lane.b32.xlu0 %v406_v43, %s2598_s7 }
  0x4b   : > { %1052 = vrot.lane.b32.xlu1 %v2761_v46, %s2601_s14  ;;  %956 = vrot.lane.b32.xlu0 %v583_v45, %s2600_s9 }
  0x4f   : > { %755 = vrot.lane.b32.xlu1 %v2761_v46, %s2596_s29  ;;  %659 = vrot.lane.b32.xlu0 %v583_v45, %s2597_s30 }
  0x53   : > { %1154 = vrot.lane.b32.xlu1 %v409_v50, %s2602_s19  ;;  %1054 = vrot.lane.b32.xlu0 %v2764_v47, %s2601_s14 }
  0x57   : > { %857 = vrot.lane.b32.xlu1 %v409_v50, %s2599_s8  ;;  %757 = vrot.lane.b32.xlu0 %v2764_v47, %s2596_s29 }
  0x5b   : > { %1255 = vrot.lane.b32.xlu1 %v586_v55, %s2603_s26  ;;  %1156 = vrot.lane.b32.xlu0 %v411_v56, %s2602_s19 }
  0x5f   : > { %859 = vrot.lane.b32.xlu1 %v411_v56, %s2599_s8  ;;  %484 = vrot.lane.b32.xlu0 %v409_v50, %s2598_s7 }
  0x63   : > { %1257 = vrot.lane.b32.xlu1 %v588_v58, %s2603_s26  ;;  %958 = vrot.lane.b32.xlu0 %v586_v55, %s2600_s9 }
  0x67   : > { %661 = vrot.lane.b32.xlu1 %v586_v55, %s2597_s30  ;;  %486 = vrot.lane.b32.xlu0 %v411_v56, %s2598_s7 }
  0x6b   : > { %1056 = vrot.lane.b32.xlu1 %v2796_v59, %s2601_s14  ;;  %960 = vrot.lane.b32.xlu0 %v588_v58, %s2600_s9 }
  0x6f   : > { %759 = vrot.lane.b32.xlu1 %v2796_v59, %s2596_s29  ;;  %663 = vrot.lane.b32.xlu0 %v588_v58, %s2597_s30  ;;  %v423_v58 = vrot.slane %v2891_v52, 1 }
  0x71   : > { %v424_v5 = vsel %vm391_vm1, %v422_v57, %v423_v58 }
  0x73   : > { %1158 = vrot.lane.b32.xlu1 %v414_v63, %s2602_s19  ;;  %1058 = vrot.lane.b32.xlu0 %v2799_v60, %s2601_s14 }
  0x77   : > { %861 = vrot.lane.b32.xlu1 %v414_v63, %s2599_s8  ;;  %761 = vrot.lane.b32.xlu0 %v2799_v60, %s2596_s29 }
  0x7b   : > { %1259 = vrot.lane.b32.xlu1 %v591_v8, %s2603_s26  ;;  %1160 = vrot.lane.b32.xlu0 %v416_v9, %s2602_s19 }
  0x7f   : > { %863 = vrot.lane.b32.xlu1 %v416_v9, %s2599_s8  ;;  %488 = vrot.lane.b32.xlu0 %v414_v63, %s2598_s7 }
  0x83   : > { %1261 = vrot.lane.b32.xlu1 %v593_v11, %s2603_s26  ;;  %962 = vrot.lane.b32.xlu0 %v591_v8, %s2600_s9 }
  0x85   : > { %v2828_v12 = vpop.permute.xlu1 %749  ;;  %v748_v13 = vpop.permute.xlu0 %747 }
  0x87   : > { %665 = vrot.lane.b32.xlu1 %v591_v8, %s2597_s30  ;;  %490 = vrot.lane.b32.xlu0 %v416_v9, %s2598_s7  ;;  %v309_v9 = vld [vmem:[%s2664_s28 + $0xa0] sm:$0x3] }
  0x88   : > { %v602_v29 = vrot.slane %v309_v9, 2 }
  0x89   : > { %v650_v15 = vpop.permute.xlu1 %649  ;;  %v473_v16 = vpop.permute.xlu0 %472 }
  0x8a   : > { %v1348_v43 = vsel %vm1347_vm3, %v2673_v2, %v473_v16  ;;  %v425_v16 = vrot.slane %v309_v9, 1 }
  0x8b   : > { %1060 = vrot.lane.b32.xlu1 %v2833_v14, %s2601_s14  ;;  %964 = vrot.lane.b32.xlu0 %v593_v11, %s2600_s9  ;;  %v1381_v48 = vsel %vm1380_vm4, %v1348_v43, %v650_v15  ;;  %v599_v15 = vrot.slane %v2883_v49, 2  ;;  %v2958_v43 = vld [vmem:[%s2664_s28 + $0xa8] sm:$0xff] }
  0x8c   : > { %v1414_v2 = vsel %vm1413_vm5, %v1381_v48, %v748_v13 }
  0x8d   : > { %v2843_v20 = vpop.permute.xlu1 %651  ;;  %v475_v21 = vpop.permute.xlu0 %474 }
  0x8e   : > { %v1349_v54 = vsel %vm1347_vm3, %v2680_v3, %v475_v21 }
  0x8f   : > { %763 = vrot.lane.b32.xlu1 %v2833_v14, %s2596_s29  ;;  %667 = vrot.lane.b32.xlu0 %v593_v11, %s2597_s30  ;;  %v1382_v3 = vsel %vm1380_vm4, %v1349_v54, %v2843_v20 }
  0x90   : > { %v1415_v6 = vsel %vm1413_vm5, %v1382_v3, %v2828_v12  ;;  %v600_v12 = vrot.slane %v2891_v52, 2 }
  0x91   : > { %v2849_v23 = vpop.permute.xlu1 %476  ;;  %v850_v24 = vpop.permute.xlu0 %849 }
  0x92   : > { %v1447_v53 = vsel %vm1446_vm6, %v1414_v2, %v850_v24  ;;  %v426_v24 = vsel %vm391_vm1, %v423_v58, %v425_v16  ;;  %v2967_v2 = vld [vmem:[%s2664_s28 + $0xb0] sm:$0xff] }
  0x93   : > { %1162 = vrot.lane.b32.xlu1 %v419_v22, %s2602_s19  ;;  %1062 = vrot.lane.b32.xlu0 %v2836_v17, %s2601_s14 }
  0x95   : > { %v951_v31 = vpop.permute.xlu1 %950  ;;  %v852_v32 = vpop.permute.xlu0 %851 }
  0x96   : > { %v1480_v55 = vsel %vm1479_vm7, %v1447_v53, %v951_v31  ;;  %v1448_v10 = vsel %vm1446_vm6, %v1415_v6, %v852_v32  ;;  %v603_v32 = vsel %vm568_vm0, %v600_v12, %v602_v29  ;;  %v428_v53 = vrot.slane %v2967_v2, 1 }
  0x97   : > { %865 = vrot.lane.b32.xlu1 %v419_v22, %s2599_s8  ;;  %765 = vrot.lane.b32.xlu0 %v2836_v17, %s2596_s29 }
  0x99   : > { %v2862_v35 = vpop.permute.xlu1 %653  ;;  %v2864_v36 = vpop.permute.xlu0 %478 }
  0x9a   : > { %v1351_v57 = vsel %vm1347_vm3, %v2667_v0, %v2864_v36  ;;  %v312_v0 = vld [vmem:[%s2664_s28 + $0xb8] sm:$0x3] }
  0x9b   : > { %1263 = vrot.lane.b32.xlu1 %v596_v33, %s2603_s26  ;;  %1164 = vrot.lane.b32.xlu0 %v421_v34, %s2602_s19  ;;  %v430_v6 = vrot.slane %v312_v0, 1 }
  0x9d   : > { %v1049_v38 = vpop.permute.xlu1 %1048  ;;  %v953_v39 = vpop.permute.xlu0 %952 }
  0x9e   : > { %v1513_v56 = vsel %vm1512_vm8, %v1480_v55, %v1049_v38  ;;  %v1481_v11 = vsel %vm1479_vm7, %v1448_v10, %v953_v39  ;;  %v1350_v39 = vsel %vm1347_vm3, %v2670_v1, %v2849_v23 }
  0x9f   : > { %867 = vrot.lane.b32.xlu1 %v421_v34, %s2599_s8  ;;  %492 = vrot.lane.b32.xlu0 %v419_v22, %s2598_s7  ;;  %v601_v22 = vsel %vm568_vm0, %v599_v15, %v600_v12  ;;  %v431_v15 = vsel %vm391_vm1, %v428_v53, %v430_v6 }
  0xa1   : > { %v2871_v41 = vpop.permute.xlu1 %751  ;;  %v2873_v42 = vpop.permute.xlu0 %655 }
  0xa2   : > { %v1384_v58 = vsel %vm1380_vm4, %v1351_v57, %v2873_v42 }
  0xa3   : > { %1265 = vrot.lane.b32.xlu1 %v598_v40, %s2603_s26  ;;  %966 = vrot.lane.b32.xlu0 %v596_v33, %s2600_s9 }
  0xa5   : > { %v1151_v44 = vpop.permute.xlu1 %1150  ;;  %v1051_v45 = vpop.permute.xlu0 %1050 }
  0xa6   : > { %v1546_v61 = vsel %vm1545_vm9, %v1513_v56, %v1151_v44  ;;  %v1514_v13 = vsel %vm1512_vm8, %v1481_v11, %v1051_v45 }
  0xa7   : > { %669 = vrot.lane.b32.xlu1 %v596_v33, %s2597_s30  ;;  %494 = vrot.lane.b32.xlu0 %v421_v34, %s2598_s7 }
  0xa9   : > { %v2886_v50 = vpop.permute.xlu1 %853  ;;  %v2888_v51 = vpop.permute.xlu0 %753 }
  0xab   : > { %1064 = vrot.lane.b32.xlu1 %v2883_v49, %s2601_s14  ;;  %968 = vrot.lane.b32.xlu0 %v598_v40, %s2600_s9 }
  0xad   : > { %v1252_v62 = vpop.permute.xlu1 %1251  ;;  %v1153_v63 = vpop.permute.xlu0 %1152 }
  0xae   : > { %v1579_v4 = vsel %vm1578_vm10, %v1546_v61, %v1252_v62  ;;  %v1547_v18 = vsel %vm1545_vm9, %v1514_v13, %v1153_v63  ;;  %v1417_v62 = vsel %vm1413_vm5, %v1384_v58, %v2888_v51  ;;  %v605_v51 = vrot.slane %v2967_v2, 2 }
  0xaf   : > { %767 = vrot.lane.b32.xlu1 %v2883_v49, %s2596_s29  ;;  %671 = vrot.lane.b32.xlu0 %v598_v40, %s2597_s30  ;;  %v1383_v40 = vsel %vm1380_vm4, %v1350_v39, %v2862_v35 }
  0xb0   : > { %2445 = vmatprep.mubr.msk.f32.mxu0 %vm1616_vm11, %v1579_v4  ;;  %v1416_v44 = vsel %vm1413_vm5, %v1383_v40, %v2871_v41  ;;  %v427_v41 = vrot.slane %v2958_v43, 1 }
  0xb1   : > { %v2914_v7 = vpop.permute.xlu1 %855  ;;  %v2916_v8 = vpop.permute.xlu0 %480  ;;  %v1449_v1 = vsel %vm1446_vm6, %v1416_v44, %v2886_v50  ;;  %v3046_v44 = vld [vmem:[%s2664_s28 + $0xc8] sm:$0xff] }
  0xb2   : > { %v429_v61 = vsel %vm391_vm1, %v427_v41, %v428_v53  ;;  %v1450_v36 = vsel %vm1446_vm6, %v1417_v62, %v2914_v7 }
  0xb3   : > { %1166 = vrot.lane.b32.xlu1 %v424_v5, %s2602_s19  ;;  %1066 = vrot.lane.b32.xlu0 %v2891_v52, %s2601_s14 }
  0xb5   : > { %v1254_v19 = vpop.permute.xlu1 %1253  ;;  %v955_v20 = vpop.permute.xlu0 %954 }
  0xb6   : > { %v1580_v21 = vsel %vm1578_vm10, %v1547_v18, %v1254_v19  ;;  %v1482_v23 = vsel %vm1479_vm7, %v1449_v1, %v955_v20  ;;  %v607_v18 = vrot.slane %v312_v0, 2  ;;  %v433_v1 = vrot.slane %v3046_v44, 1 }
  0xb7   : > { %869 = vrot.lane.b32.xlu1 %v424_v5, %s2599_s8  ;;  %769 = vrot.lane.b32.xlu0 %v2891_v52, %s2596_s29 }
  0xb8   : > { %2446 = vmatmul.mubr.msk.f32.vlgmr.msra.gmra.mrb[0].mxu0 %vm1616_vm11, %v1580_v21  ;;  %v608_v21 = vsel %vm568_vm0, %v605_v51, %v607_v18 }
  0xb9   : > { %v2935_v26 = vpop.permute.xlu1 %657  ;;  %v2937_v28 = vpop.permute.xlu0 %482 }
  0xba   : > { %v1353_v53 = vsel %vm1347_vm3, %v2714_v27, %v2937_v28  ;;  %v315_v27 = vld [vmem:[%s2664_s28 + $0xd0] sm:$0x3] }
  0xbb   : > { %1267 = vrot.lane.b32.xlu1 %v601_v22, %s2603_s26  ;;  %1168 = vrot.lane.b32.xlu0 %v426_v24, %s2602_s19  ;;  %v435_v62 = vrot.slane %v315_v27, 1 }
  0xbd   : > { %v1053_v30 = vpop.permute.xlu1 %1052  ;;  %v957_v31 = vpop.permute.xlu0 %956 }
  0xbe   : > { %v1515_v35 = vsel %vm1512_vm8, %v1482_v23, %v1053_v30  ;;  %v1483_v4 = vsel %vm1479_vm7, %v1450_v36, %v957_v31  ;;  %v1352_v31 = vsel %vm1347_vm3, %v2710_v25, %v2916_v8 }
  0xbf   : > { %871 = vrot.lane.b32.xlu1 %v426_v24, %s2599_s8  ;;  %496 = vrot.lane.b32.xlu0 %v424_v5, %s2598_s7  ;;  %v604_v5 = vrot.slane %v2958_v43, 2 }
  0xc1   : > { %v2944_v33 = vpop.permute.xlu1 %755  ;;  %v2946_v34 = vpop.permute.xlu0 %659  ;;  %v606_v13 = vsel %vm568_vm0, %v604_v5, %v605_v51  ;;  %v436_v5 = vsel %vm391_vm1, %v433_v1, %v435_v62 }
  0xc3   : > { %1269 = vrot.lane.b32.xlu1 %v603_v32, %s2603_s26  ;;  %970 = vrot.lane.b32.xlu0 %v601_v22, %s2600_s9 }
  0xc5   : > { %v1155_v37 = vpop.permute.xlu1 %1154  ;;  %v1055_v38 = vpop.permute.xlu0 %1054 }
  0xc6   : > { %v1548_v54 = vsel %vm1545_vm9, %v1515_v35, %v1155_v37  ;;  %v1516_v42 = vsel %vm1512_vm8, %v1483_v4, %v1055_v38  ;;  %v3037_v37 = vld [vmem:[%s2664_s28 + $0xc0] sm:$0xff] }
  0xc7   : > { %673 = vrot.lane.b32.xlu1 %v601_v22, %s2597_s30  ;;  %498 = vrot.lane.b32.xlu0 %v426_v24, %s2598_s7 }
  0xc9   : > { %v2962_v45 = vpop.permute.xlu1 %857  ;;  %v2964_v48 = vpop.permute.xlu0 %757 }
  0xcb   : > { %1068 = vrot.lane.b32.xlu1 %v2958_v43, %s2601_s14  ;;  %972 = vrot.lane.b32.xlu0 %v603_v32, %s2600_s9 }
  0xcd   : > { %v1256_v55 = vpop.permute.xlu1 %1255  ;;  %v1157_v56 = vpop.permute.xlu0 %1156 }
  0xce   : > { %v1581_v50 = vsel %vm1578_vm10, %v1548_v54, %v1256_v55  ;;  %v1549_v9 = vsel %vm1545_vm9, %v1516_v42, %v1157_v56  ;;  %v1386_v54 = vsel %vm1380_vm4, %v1353_v53, %v2946_v34 }
  0xcf   : > { %771 = vrot.lane.b32.xlu1 %v2958_v43, %s2596_s29  ;;  %675 = vrot.lane.b32.xlu0 %v603_v32, %s2597_s30  ;;  %v1385_v32 = vsel %vm1380_vm4, %v1352_v31, %v2935_v26  ;;  %v1419_v56 = vsel %vm1413_vm5, %v1386_v54, %v2964_v48  ;;  %v610_v48 = vrot.slane %v3046_v44, 2 }
  0xd0   : > { %2448 = vmatprep.mubr.msk.f32.mxu0 %vm1616_vm11, %v1581_v50  ;;  %v1418_v38 = vsel %vm1413_vm5, %v1385_v32, %v2944_v33  ;;  %v432_v33 = vrot.slane %v3037_v37, 1 }
  0xd1   : > { %v2992_v63 = vpop.permute.xlu1 %859  ;;  %v2994_v3 = vpop.permute.xlu0 %484  ;;  %v1451_v25 = vsel %vm1446_vm6, %v1418_v38, %v2962_v45  ;;  %v3125_v38 = vld [vmem:[%s2664_s28 + $0xe0] sm:$0xff] }
  0xd2   : > { %v434_v55 = vsel %vm391_vm1, %v432_v33, %v433_v1  ;;  %v1452_v28 = vsel %vm1446_vm6, %v1419_v56, %v2992_v63 }
  0xd3   : > { %1170 = vrot.lane.b32.xlu1 %v429_v61, %s2602_s19  ;;  %1070 = vrot.lane.b32.xlu0 %v2967_v2, %s2601_s14 }
  0xd5   : > { %v1258_v10 = vpop.permute.xlu1 %1257  ;;  %v959_v11 = vpop.permute.xlu0 %958 }
  0xd6   : > { %v1582_v7 = vsel %vm1578_vm10, %v1549_v9, %v1258_v10  ;;  %v1484_v8 = vsel %vm1479_vm7, %v1451_v25, %v959_v11  ;;  %v612_v9 = vrot.slane %v315_v27, 2  ;;  %v438_v25 = vrot.slane %v3125_v38, 1 }
  0xd7   : > { %873 = vrot.lane.b32.xlu1 %v429_v61, %s2599_s8  ;;  %773 = vrot.lane.b32.xlu0 %v2967_v2, %s2596_s29 }
  0xd8   : > { %2449 = vmatmul.mubr.msk.f32.gmra.mrb[2].mxu0 %vm1616_vm11, %v1582_v7  ;;  %v613_v7 = vsel %vm568_vm0, %v610_v48, %v612_v9 }
  0xd9   : > { %v3014_v12 = vpop.permute.xlu1 %661  ;;  %v3016_v16 = vpop.permute.xlu0 %486 }
  0xda   : > { %v1355_v1 = vsel %vm1347_vm3, %v2764_v47, %v3016_v16  ;;  %v318_v47 = vld [vmem:[%s2664_s28 + $0xe8] sm:$0x3] }
  0xdb   : > { %1271 = vrot.lane.b32.xlu1 %v606_v13, %s2603_s26  ;;  %1172 = vrot.lane.b32.xlu0 %v431_v15, %s2602_s19  ;;  %v440_v56 = vrot.slane %v318_v47, 1 }
  0xdd   : > { %v1057_v19 = vpop.permute.xlu1 %1056  ;;  %v961_v20 = vpop.permute.xlu0 %960 }
  0xde   : > { %v1517_v26 = vsel %vm1512_vm8, %v1484_v8, %v1057_v19  ;;  %v1485_v58 = vsel %vm1479_vm7, %v1452_v28, %v961_v20  ;;  %v1354_v20 = vsel %vm1347_vm3, %v2761_v46, %v2994_v3 }
  0xdf   : > { %875 = vrot.lane.b32.xlu1 %v431_v15, %s2599_s8  ;;  %500 = vrot.lane.b32.xlu0 %v429_v61, %s2598_s7  ;;  %v609_v61 = vrot.slane %v3037_v37, 2 }
  0xe1   : > { %v3023_v22 = vpop.permute.xlu1 %759  ;;  %v3025_v24 = vpop.permute.xlu0 %663  ;;  %v611_v42 = vsel %vm568_vm0, %v609_v61, %v610_v48  ;;  %v441_v61 = vsel %vm391_vm1, %v438_v25, %v440_v56 }
  0xe3   : > { %1273 = vrot.lane.b32.xlu1 %v608_v21, %s2603_s26  ;;  %974 = vrot.lane.b32.xlu0 %v606_v13, %s2600_s9 }
  0xe5   : > { %v1159_v29 = vpop.permute.xlu1 %1158  ;;  %v1059_v30 = vpop.permute.xlu0 %1058 }
  0xe6   : > { %v1550_v23 = vsel %vm1545_vm9, %v1517_v26, %v1159_v29  ;;  %v1518_v34 = vsel %vm1512_vm8, %v1485_v58, %v1059_v30  ;;  %v3116_v29 = vld [vmem:[%s2664_s28 + $0xd8] sm:$0xff] }
  0xe7   : > { %677 = vrot.lane.b32.xlu1 %v606_v13, %s2597_s30  ;;  %502 = vrot.lane.b32.xlu0 %v431_v15, %s2598_s7 }
  0xe9   : > { %v3041_v39 = vpop.permute.xlu1 %861  ;;  %v3043_v40 = vpop.permute.xlu0 %761 }
  0xeb   : > { %1072 = vrot.lane.b32.xlu1 %v3037_v37, %s2601_s14  ;;  %976 = vrot.lane.b32.xlu0 %v608_v21, %s2600_s9 }
  0xed   : > { %v1260_v35 = vpop.permute.xlu1 %1259  ;;  %v1161_v41 = vpop.permute.xlu0 %1160 }
  0xee   : > { %v1583_v45 = vsel %vm1578_vm10, %v1550_v23, %v1260_v35  ;;  %v1551_v0 = vsel %vm1545_vm9, %v1518_v34, %v1161_v41  ;;  %v1388_v23 = vsel %vm1380_vm4, %v1355_v1, %v3025_v24 }
  0xef   : > { %775 = vrot.lane.b32.xlu1 %v3037_v37, %s2596_s29  ;;  %679 = vrot.lane.b32.xlu0 %v608_v21, %s2597_s30  ;;  %v1387_v21 = vsel %vm1380_vm4, %v1354_v20, %v3014_v12  ;;  %v1421_v41 = vsel %vm1413_vm5, %v1388_v23, %v3043_v40  ;;  %v614_v40 = vrot.slane %v3116_v29, 2 }
  0xf0   : > { %2451 = vmatprep.mubr.msk.f32.mxu0 %vm1616_vm11, %v1583_v45  ;;  %v1420_v30 = vsel %vm1413_vm5, %v1387_v21, %v3023_v22  ;;  %v437_v22 = vrot.slane %v3116_v29, 1 }
  0xf1   : > { %v3071_v50 = vpop.permute.xlu1 %863  ;;  %v3073_v57 = vpop.permute.xlu0 %488  ;;  %v1453_v46 = vsel %vm1446_vm6, %v1420_v30, %v3041_v39 }
  0xf2   : > { %v3148_v35 = vsel %vm391_vm1, %v437_v22, %v438_v25  ;;  %v1454_v16 = vsel %vm1446_vm6, %v1421_v41, %v3071_v50  ;;  %v1356_v30 = vsel %vm1347_vm3, %v2796_v59, %v3073_v57 }
  0xf3   : > { %1174 = vrot.lane.b32.xlu1 %v434_v55, %s2602_s19  ;;  %1074 = vrot.lane.b32.xlu0 %v3046_v44, %s2601_s14 }
  0xf5   : > { %v1262_v36 = vpop.permute.xlu1 %1261  ;;  %v963_v4 = vpop.permute.xlu0 %962 }
  0xf6   : > { %v1584_v63 = vsel %vm1578_vm10, %v1551_v0, %v1262_v36  ;;  %v1486_v3 = vsel %vm1479_vm7, %v1453_v46, %v963_v4  ;;  %v617_v0 = vrot.slane %v318_v47, 2 }
  0xf7   : > { %877 = vrot.lane.b32.xlu1 %v434_v55, %s2599_s8  ;;  %777 = vrot.lane.b32.xlu0 %v3046_v44, %s2596_s29 }
  0xf8   : > { %2452 = vmatmul.mubr.msk.f32.gmra.mrb[4].mxu0 %vm1616_vm11, %v1584_v63 }
  0xf9   : > { %v3093_v51 = vpop.permute.xlu1 %665  ;;  %v3095_v6 = vpop.permute.xlu0 %490 }
  0xfa   : > { %v1357_v47 = vsel %vm1347_vm3, %v2799_v60, %v3095_v6 }
  0xfb   : > { %1275 = vrot.lane.b32.xlu1 %v611_v42, %s2603_s26  ;;  %1176 = vrot.lane.b32.xlu0 %v436_v5, %s2602_s19 }
  0xfd   : > { %v1061_v10 = vpop.permute.xlu1 %1060  ;;  %v965_v11 = vpop.permute.xlu0 %964 }
  0xfe   : > { %v1519_v12 = vsel %vm1512_vm8, %v1486_v3, %v1061_v10  ;;  %v1487_v54 = vsel %vm1479_vm7, %v1454_v16, %v965_v11  ;;  %v3198_v11 = vld [vmem:[%s2664_s28 + $0xf0] sm:$0xff]  ;;  %v1389_v3 = vsel %vm1380_vm4, %v1356_v30, %v3093_v51 }
  0xff   : > { %879 = vrot.lane.b32.xlu1 %v436_v5, %s2599_s8  ;;  %504 = vrot.lane.b32.xlu0 %v434_v55, %s2598_s7  ;;  %v615_v55 = vrot.slane %v3125_v38, 2  ;;  %v619_v22 = vrot.slane %v3198_v11, 2 }
 0x101   : > { %v3102_v13 = vpop.permute.xlu1 %763  ;;  %v3104_v15 = vpop.permute.xlu0 %667  ;;  %v3175_v34 = vsel %vm568_vm0, %v614_v40, %v615_v55  ;;  %v618_v63 = vsel %vm568_vm0, %v615_v55, %v617_v0 }
 0x102   : > { %v1422_v59 = vsel %vm1413_vm5, %v1389_v3, %v3102_v13  ;;  %v1390_v16 = vsel %vm1380_vm4, %v1357_v47, %v3104_v15 }
 0x103   : > { %1277 = vrot.lane.b32.xlu1 %v613_v7, %s2603_s26  ;;  %978 = vrot.lane.b32.xlu0 %v611_v42, %s2600_s9 }
 0x105   : > { %v1163_v18 = vpop.permute.xlu1 %1162  ;;  %v1063_v19 = vpop.permute.xlu0 %1062 }
 0x106   : > { %v1552_v8 = vsel %vm1545_vm9, %v1519_v12, %v1163_v18  ;;  %v1520_v24 = vsel %vm1512_vm8, %v1487_v54, %v1063_v19  ;;  %v442_v19 = vrot.slane %v3198_v11, 1 }
 0x107   : > { %681 = vrot.lane.b32.xlu1 %v611_v42, %s2597_s30  ;;  %506 = vrot.lane.b32.xlu0 %v436_v5, %s2598_s7  ;;  %v3190_v42 = vld [vmem:[%s2664_s28 + $0xf8] sm:$0xff]  ;;  %v321_v5 = vld [vmem:[%s2664_s28 + $0x100] sm:$0x3] }
 0x108   : > { %v445_v18 = vrot.slane %v321_v5, 1  ;;  %v620_v25 = vrot.slane %v3190_v42, 2  ;;  %v622_v13 = vrot.slane %v321_v5, 2 }
 0x109   : > { %v3120_v31 = vpop.permute.xlu1 %865  ;;  %v3122_v32 = vpop.permute.xlu0 %765 }
 0x10a   : > { %v3251_v54 = vsel %vm568_vm0, %v620_v25, %v622_v13 }
 0x10b   : > { %1076 = vrot.lane.b32.xlu1 %v3116_v29, %s2601_s14  ;;  %980 = vrot.lane.b32.xlu0 %v613_v7, %s2600_s9 }
 0x10d   : > { %v1264_v26 = vpop.permute.xlu1 %1263  ;;  %v1165_v33 = vpop.permute.xlu0 %1164 }
 0x10e   : > { %v1585_v39 = vsel %vm1578_vm10, %v1552_v8, %v1264_v26  ;;  %v1553_v27 = vsel %vm1545_vm9, %v1520_v24, %v1165_v33  ;;  %v1455_v26 = vsel %vm1446_vm6, %v1422_v59, %v3120_v31  ;;  %v1423_v24 = vsel %vm1413_vm5, %v1390_v16, %v3122_v32 }
 0x10f   : > { %779 = vrot.lane.b32.xlu1 %v3116_v29, %s2596_s29  ;;  %683 = vrot.lane.b32.xlu0 %v613_v7, %s2597_s30  ;;  %v443_v7 = vrot.slane %v3190_v42, 1 }
 0x110   : > { %2454 = vmatprep.mubr.msk.f32.mxu0 %vm1616_vm11, %v1585_v39  ;;  %v3236_v39 = vsel %vm568_vm0, %v619_v22, %v620_v25 }
 0x111   : > { %v3152_v45 = vpop.permute.xlu1 %867  ;;  %v3154_v53 = vpop.permute.xlu0 %492  ;;  %v3212_v46 = vsel %vm391_vm1, %v443_v7, %v445_v18  ;;  %v3217_v12 = vsel %vm391_vm1, %v442_v19, %v443_v7 }
 0x112   : > { %v1456_v6 = vsel %vm1446_vm6, %v1423_v24, %v3152_v45 }
 0x113   : > { %1178 = vrot.lane.b32.xlu1 %v3148_v35, %s2602_s19  ;;  %1078 = vrot.lane.b32.xlu0 %v3125_v38, %s2601_s14 }
 0x115   : > { %v1266_v28 = vpop.permute.xlu1 %1265  ;;  %v967_v58 = vpop.permute.xlu0 %966 }
 0x116   : > { %v1586_v50 = vsel %vm1578_vm10, %v1553_v27, %v1266_v28  ;;  %v1488_v33 = vsel %vm1479_vm7, %v1455_v26, %v967_v58 }
 0x117   : > { %881 = vrot.lane.b32.xlu1 %v3148_v35, %s2599_s8  ;;  %781 = vrot.lane.b32.xlu0 %v3125_v38, %s2596_s29 }
 0x118   : > { %2455 = vmatmul.mubr.msk.f32.gmra.mrb[6].mxu0 %vm1616_vm11, %v1586_v50 }
 0x119   : > { %v3178_v48 = vpop.permute.xlu1 %669  ;;  %v3180_v62 = vpop.permute.xlu0 %494 }
 0x11b   : > { %1279 = vrot.lane.b32.xlu1 %v3175_v34, %s2603_s26  ;;  %1180 = vrot.lane.b32.xlu0 %v441_v61, %s2602_s19 }
 0x11d   : > { %v1065_v36 = vpop.permute.xlu1 %1064  ;;  %v969_v4 = vpop.permute.xlu0 %968 }
 0x11e   : > { %v1521_v51 = vsel %vm1512_vm8, %v1488_v33, %v1065_v36 }
 0x11f   : > { %982 = vrot.lane.b32.xlu1 %v3175_v34, %s2600_s9  ;;  %883 = vrot.lane.b32.xlu0 %v441_v61, %s2599_s8 }
 0x121   : > { %v3193_v9 = vpop.permute.xlu1 %767  ;;  %v3195_v10 = vpop.permute.xlu0 %671 }
 0x123   : > { %984 = vrot.lane.b32.xlu1 %v618_v63, %s2600_s9  ;;  %1281 = vrot.lane.b32.xlu0 %v618_v63, %s2603_s26 }
 0x125   : > { %v1167_v20 = vpop.permute.xlu1 %1166  ;;  %v1067_v21 = vpop.permute.xlu0 %1066 }
 0x126   : > { %v1554_v1 = vsel %vm1545_vm9, %v1521_v51, %v1167_v20  ;;  %v1358_v20 = vsel %vm1347_vm3, %v2833_v14, %v3154_v53 }
 0x127   : > { %1082 = vrot.lane.b32.xlu1 %v3190_v42, %s2601_s14  ;;  %1080 = vrot.lane.b32.xlu0 %v3198_v11, %s2601_s14  ;;  %v1391_v30 = vsel %vm1380_vm4, %v1358_v20, %v3178_v48 }
 0x128   : > { %v1424_v14 = vsel %vm1413_vm5, %v1391_v30, %v3193_v9 }
 0x129   : > { %v3223_v57 = vpop.permute.xlu1 %869  ;;  %v3225_v8 = vpop.permute.xlu0 %769 }
 0x12a   : > { %v1457_v26 = vsel %vm1446_vm6, %v1424_v14, %v3223_v57 }
 0x12b   : > { %1184 = vrot.lane.b32.xlu1 %v3212_v46, %s2602_s19  ;;  %1182 = vrot.lane.b32.xlu0 %v3217_v12, %s2602_s19 }
 0x12d   : > { %v1268_v23 = vpop.permute.xlu1 %1267  ;;  %v1169_v41 = vpop.permute.xlu0 %1168 }
 0x12e   : > { %v1587_v31 = vsel %vm1578_vm10, %v1554_v1, %v1268_v23 }
 0x12f   : > { %508 = vrot.lane.b32.xlu1 %v3148_v35, %s2598_s7  ;;  %1283 = vrot.lane.b32.xlu0 %v3236_v39, %s2603_s26  ;;  %v1489_v35 = vsel %vm1479_vm7, %v1456_v6, %v969_v4  ;;  %v3293_v4 = vld [vmem:[%s2664_s28 + $0x108] sm:$0xff] }
 0x130   : > { %2457 = vmatprep.mubr.msk.f32.mxu0 %vm1616_vm11, %v1587_v31  ;;  %v1522_v15 = vsel %vm1512_vm8, %v1489_v35, %v1067_v21  ;;  %v447_v7 = vrot.slane %v3293_v4, 1  ;;  %v624_v22 = vrot.slane %v3293_v4, 2 }
 0x131   : > { %v3255_v40 = vpop.permute.xlu1 %871  ;;  %v3257_v60 = vpop.permute.xlu0 %496  ;;  %v1555_v55 = vsel %vm1545_vm9, %v1522_v15, %v1169_v41  ;;  %v1359_v41 = vsel %vm1347_vm3, %v2836_v17, %v3180_v62 }
 0x132   : > { %v1392_v31 = vsel %vm1380_vm4, %v1359_v41, %v3195_v10 }
 0x133   : > { %510 = vrot.lane.b32.xlu1 %v441_v61, %s2598_s7  ;;  %1285 = vrot.lane.b32.xlu0 %v3251_v54, %s2603_s26  ;;  %v324_v61 = vld [vmem:[%s2664_s28 + $0x118] sm:$0x3]  ;;  %v1425_v16 = vsel %vm1413_vm5, %v1392_v31, %v3225_v8 }
 0x134   : > { %v450_v5 = vrot.slane %v324_v61, 1  ;;  %v627_v9 = vrot.slane %v324_v61, 2  ;;  %v1458_v62 = vsel %vm1446_vm6, %v1425_v16, %v3255_v40 }
 0x135   : > { %v1270_v32 = vpop.permute.xlu1 %1269  ;;  %v971_v56 = vpop.permute.xlu0 %970 }
 0x136   : > { %v1588_v27 = vsel %vm1578_vm10, %v1555_v55, %v1270_v32  ;;  %v1490_v33 = vsel %vm1479_vm7, %v1457_v26, %v971_v56 }
 0x137   : > { %687 = vrot.lane.b32.xlu1 %v618_v63, %s2597_s30  ;;  %685 = vrot.lane.b32.xlu0 %v3175_v34, %s2597_s30  ;;  %v3285_v34 = vld [vmem:[%s2664_s28 + $0x110] sm:$0xff] }
 0x138   : > { %2458 = vmatmul.mubr.msk.f32.gmra.mrb[8].mxu0 %vm1616_vm11, %v1588_v27  ;;  %v448_v63 = vrot.slane %v3285_v34, 1  ;;  %v625_v25 = vrot.slane %v3285_v34, 2 }
 0x139   : > { %v3272_v45 = vpop.permute.xlu1 %673  ;;  %v3274_v28 = vpop.permute.xlu0 %498 }
 0x13a   : > { %v3309_v21 = vsel %vm391_vm1, %v448_v63, %v450_v5  ;;  %v3314_v3 = vsel %vm391_vm1, %v447_v7, %v448_v63  ;;  %v3333_v51 = vsel %vm568_vm0, %v624_v22, %v625_v25  ;;  %v3348_v47 = vsel %vm568_vm0, %v625_v25, %v627_v9 }
 0x13b   : > { %785 = vrot.lane.b32.xlu1 %v3190_v42, %s2596_s29  ;;  %783 = vrot.lane.b32.xlu0 %v3198_v11, %s2596_s29 }
 0x13d   : > { %v1069_v58 = vpop.permute.xlu1 %1068  ;;  %v973_v50 = vpop.permute.xlu0 %972 }
 0x13e   : > { %v1523_v48 = vsel %vm1512_vm8, %v1490_v33, %v1069_v58  ;;  %v3392_v58 = vld [vmem:[%s2664_s28 + $0x120] sm:$0xff] }
 0x13f   : > { %887 = vrot.lane.b32.xlu1 %v3212_v46, %s2599_s8  ;;  %885 = vrot.lane.b32.xlu0 %v3217_v12, %s2599_s8  ;;  %v452_v63 = vrot.slane %v3392_v58, 1  ;;  %v629_v22 = vrot.slane %v3392_v58, 2 }
 0x141   : > { %v3288_v0 = vpop.permute.xlu1 %771  ;;  %v3290_v36 = vpop.permute.xlu0 %675 }
 0x143   : > { %988 = vrot.lane.b32.xlu1 %v3251_v54, %s2600_s9  ;;  %986 = vrot.lane.b32.xlu0 %v3236_v39, %s2600_s9 }
 0x145   : > { %v1171_v18 = vpop.permute.xlu1 %1170  ;;  %v1071_v19 = vpop.permute.xlu0 %1070 }
 0x146   : > { %v1556_v13 = vsel %vm1545_vm9, %v1523_v48, %v1171_v18  ;;  %v1360_v18 = vsel %vm1347_vm3, %v2883_v49, %v3257_v60 }
 0x147   : > { %1086 = vrot.lane.b32.xlu1 %v3285_v34, %s2601_s14  ;;  %1084 = vrot.lane.b32.xlu0 %v3293_v4, %s2601_s14  ;;  %v1393_v20 = vsel %vm1380_vm4, %v1360_v18, %v3272_v45 }
 0x148   : > { %v1426_v49 = vsel %vm1413_vm5, %v1393_v20, %v3288_v0 }
 0x149   : > { %v3320_v53 = vpop.permute.xlu1 %873  ;;  %v3322_v59 = vpop.permute.xlu0 %773 }
 0x14a   : > { %v1459_v26 = vsel %vm1446_vm6, %v1426_v49, %v3320_v53 }
 0x14b   : > { %1188 = vrot.lane.b32.xlu1 %v3309_v21, %s2602_s19  ;;  %1186 = vrot.lane.b32.xlu0 %v3314_v3, %s2602_s19 }
 0x14d   : > { %v1272_v1 = vpop.permute.xlu1 %1271  ;;  %v1173_v23 = vpop.permute.xlu0 %1172 }
 0x14e   : > { %v1589_v57 = vsel %vm1578_vm10, %v1556_v13, %v1272_v1 }
 0x14f   : > { %512 = vrot.lane.b32.xlu1 %v3217_v12, %s2598_s7  ;;  %1287 = vrot.lane.b32.xlu0 %v3333_v51, %s2603_s26  ;;  %v1491_v12 = vsel %vm1479_vm7, %v1458_v62, %v973_v50 }
 0x150   : > { %2460 = vmatprep.mubr.msk.f32.mxu0 %vm1616_vm11, %v1589_v57  ;;  %v1524_v10 = vsel %vm1512_vm8, %v1491_v12, %v1071_v19 }
 0x151   : > { %v3352_v24 = vpop.permute.xlu1 %875  ;;  %v3354_v17 = vpop.permute.xlu0 %500  ;;  %v1557_v8 = vsel %vm1545_vm9, %v1524_v10, %v1173_v23  ;;  %v1361_v23 = vsel %vm1347_vm3, %v2891_v52, %v3274_v28 }
 0x152   : > { %v1394_v57 = vsel %vm1380_vm4, %v1361_v23, %v3290_v36 }
 0x153   : > { %514 = vrot.lane.b32.xlu1 %v3212_v46, %s2598_s7  ;;  %1289 = vrot.lane.b32.xlu0 %v3348_v47, %s2603_s26  ;;  %v1427_v31 = vsel %vm1413_vm5, %v1394_v57, %v3322_v59 }
 0x154   : > { %v1460_v28 = vsel %vm1446_vm6, %v1427_v31, %v3352_v24 }
 0x155   : > { %v1274_v6 = vpop.permute.xlu1 %1273  ;;  %v975_v35 = vpop.permute.xlu0 %974 }
 0x156   : > { %v1590_v15 = vsel %vm1578_vm10, %v1557_v8, %v1274_v6  ;;  %v1492_v33 = vsel %vm1479_vm7, %v1459_v26, %v975_v35  ;;  %v3523_v26 = vld [vmem:[%s4084_s2] ss:$0 sm:$0xff] }
 0x157   : > { %691 = vrot.lane.b32.xlu1 %v3251_v54, %s2597_s30  ;;  %689 = vrot.lane.b32.xlu0 %v3236_v39, %s2597_s30  ;;  %v3384_v39 = vld [vmem:[%s2664_s28 + $0x128] sm:$0xff]  ;;  %v327_v54 = vld [vmem:[%s2664_s28 + $0x130] sm:$0x3] }
 0x158   : > { %2461 = vmatmul.mubr.msk.f32.gmra.mrb[10].mxu0 %vm1616_vm11, %v1590_v15  ;;  %v453_v50 = vrot.slane %v3384_v39, 1  ;;  %v455_v61 = vrot.slane %v327_v54, 1  ;;  %v630_v25 = vrot.slane %v3384_v39, 2  ;;  %v632_v0 = vrot.slane %v327_v54, 2 }
 0x159   : > { %v3371_v46 = vpop.permute.xlu1 %677  ;;  %v3373_v40 = vpop.permute.xlu0 %502 }
 0x15a   : > { %v3408_v19 = vsel %vm391_vm1, %v453_v50, %v455_v61  ;;  %v3413_v30 = vsel %vm391_vm1, %v452_v63, %v453_v50  ;;  %v3432_v48 = vsel %vm568_vm0, %v629_v22, %v630_v25  ;;  %v3447_v41 = vsel %vm568_vm0, %v630_v25, %v632_v0  ;;  %v3531_v0 = vld [vmem:[%s4085_s3] ss:$0 sm:$0xff] }
 0x15b   : > { %789 = vrot.lane.b32.xlu1 %v3285_v34, %s2596_s29  ;;  %787 = vrot.lane.b32.xlu0 %v3293_v4, %s2596_s29 }
 0x15d   : > { %v1073_v55 = vpop.permute.xlu1 %1072  ;;  %v977_v32 = vpop.permute.xlu0 %976 }
 0x15e   : > { %v1525_v45 = vsel %vm1512_vm8, %v1492_v33, %v1073_v55  ;;  %v3491_v55 = vld [vmem:[%s2664_s28 + $0x138] sm:$0xff] }
 0x15f   : > { %891 = vrot.lane.b32.xlu1 %v3309_v21, %s2599_s8  ;;  %889 = vrot.lane.b32.xlu0 %v3314_v3, %s2599_s8  ;;  %v457_v50 = vrot.slane %v3491_v55, 1  ;;  %v634_v22 = vrot.slane %v3491_v55, 2 }
 0x161   : > { %v3387_v56 = vpop.permute.xlu1 %775  ;;  %v3389_v27 = vpop.permute.xlu0 %679 }
 0x163   : > { %992 = vrot.lane.b32.xlu1 %v3348_v47, %s2600_s9  ;;  %990 = vrot.lane.b32.xlu0 %v3333_v51, %s2600_s9 }
 0x165   : > { %v1175_v5 = vpop.permute.xlu1 %1174  ;;  %v1075_v7 = vpop.permute.xlu0 %1074 }
 0x166   : > { %v1558_v9 = vsel %vm1545_vm9, %v1525_v45, %v1175_v5  ;;  %v1362_v5 = vsel %vm1347_vm3, %v2958_v43, %v3354_v17 }
 0x167   : > { %1090 = vrot.lane.b32.xlu1 %v3384_v39, %s2601_s14  ;;  %1088 = vrot.lane.b32.xlu0 %v3392_v58, %s2601_s14  ;;  %v1395_v18 = vsel %vm1380_vm4, %v1362_v5, %v3371_v46 }
 0x168   : > { %v1428_v43 = vsel %vm1413_vm5, %v1395_v18, %v3387_v56 }
 0x169   : > { %v3419_v60 = vpop.permute.xlu1 %877  ;;  %v3421_v14 = vpop.permute.xlu0 %777 }
 0x16a   : > { %v1461_v46 = vsel %vm1446_vm6, %v1428_v43, %v3419_v60 }
 0x16b   : > { %1192 = vrot.lane.b32.xlu1 %v3408_v19, %s2602_s19  ;;  %1190 = vrot.lane.b32.xlu0 %v3413_v30, %s2602_s19 }
 0x16d   : > { %v1276_v13 = vpop.permute.xlu1 %1275  ;;  %v1177_v1 = vpop.permute.xlu0 %1176 }
 0x16e   : > { %v1591_v53 = vsel %vm1578_vm10, %v1558_v9, %v1276_v13 }
 0x16f   : > { %516 = vrot.lane.b32.xlu1 %v3314_v3, %s2598_s7  ;;  %1291 = vrot.lane.b32.xlu0 %v3432_v48, %s2603_s26  ;;  %v1493_v3 = vsel %vm1479_vm7, %v1460_v28, %v977_v32 }
 0x170   : > { %2463 = vmatprep.mubr.msk.f32.mxu0 %vm1616_vm11, %v1591_v53  ;;  %v1526_v36 = vsel %vm1512_vm8, %v1493_v3, %v1075_v7 }
 0x171   : > { %v3451_v16 = vpop.permute.xlu1 %879  ;;  %v3453_v52 = vpop.permute.xlu0 %504  ;;  %v1559_v59 = vsel %vm1545_vm9, %v1526_v36, %v1177_v1  ;;  %v1363_v36 = vsel %vm1347_vm3, %v2967_v2, %v3373_v40 }
 0x173   : > { %518 = vrot.lane.b32.xlu1 %v3309_v21, %s2598_s7  ;;  %1293 = vrot.lane.b32.xlu0 %v3447_v41, %s2603_s26 }
 0x175   : > { %v1278_v62 = vpop.permute.xlu1 %1277  ;;  %v979_v12 = vpop.permute.xlu0 %978 }
 0x176   : > { %v1592_v10 = vsel %vm1578_vm10, %v1559_v59, %v1278_v62  ;;  %v1494_v33 = vsel %vm1479_vm7, %v1461_v46, %v979_v12  ;;  %v1396_v62 = vsel %vm1380_vm4, %v1363_v36, %v3389_v27 }
 0x177   : > { %695 = vrot.lane.b32.xlu1 %v3348_v47, %s2597_s30  ;;  %693 = vrot.lane.b32.xlu0 %v3333_v51, %s2597_s30  ;;  %v3483_v51 = vld [vmem:[%s2664_s28 + $0x140] sm:$0xff]  ;;  %v330_v47 = vld [vmem:[%s2664_s28 + $0x148] sm:$0x3]  ;;  %v1429_v2 = vsel %vm1413_vm5, %v1396_v62, %v3421_v14 }
 0x178   : > { %2464 = vmatmul.mubr.msk.f32.gmra.mrb[12].mxu0 %vm1616_vm11, %v1592_v10  ;;  %v458_v32 = vrot.slane %v3483_v51, 1  ;;  %v460_v54 = vrot.slane %v330_v47, 1  ;;  %v635_v25 = vrot.slane %v3483_v51, 2  ;;  %v637_v1 = vrot.slane %v330_v47, 2 }
 0x179   : > { %v3470_v21 = vpop.permute.xlu1 %681  ;;  %v3472_v24 = vpop.permute.xlu0 %506  ;;  %v1462_v47 = vsel %vm1446_vm6, %v1429_v2, %v3451_v16 }
 0x17a   : > { %v3507_v7 = vsel %vm391_vm1, %v458_v32, %v460_v54  ;;  %v3512_v20 = vsel %vm391_vm1, %v457_v50, %v458_v32  ;;  %v3540_v60 = vsel %vm568_vm0, %v634_v22, %v635_v25  ;;  %v3558_v12 = vsel %vm568_vm0, %v635_v25, %v637_v1 }
 0x17b   : > { %793 = vrot.lane.b32.xlu1 %v3384_v39, %s2596_s29  ;;  %791 = vrot.lane.b32.xlu0 %v3392_v58, %s2596_s29 }
 0x17d   : > { %v1077_v8 = vpop.permute.xlu1 %1076  ;;  %v981_v6 = vpop.permute.xlu0 %980 }
 0x17e   : > { %v1527_v56 = vsel %vm1512_vm8, %v1494_v33, %v1077_v8  ;;  %v1495_v27 = vsel %vm1479_vm7, %v1462_v47, %v981_v6 }
 0x17f   : > { %895 = vrot.lane.b32.xlu1 %v3408_v19, %s2599_s8  ;;  %893 = vrot.lane.b32.xlu0 %v3413_v30, %s2599_s8 }
 0x181   : > { %v3486_v35 = vpop.permute.xlu1 %779  ;;  %v3488_v15 = vpop.permute.xlu0 %683 }
 0x183   : > { %996 = vrot.lane.b32.xlu1 %v3447_v41, %s2600_s9  ;;  %994 = vrot.lane.b32.xlu0 %v3432_v48, %s2600_s9 }
 0x185   : > { %v1179_v61 = vpop.permute.xlu1 %1178  ;;  %v1079_v63 = vpop.permute.xlu0 %1078 }
 0x186   : > { %v1560_v53 = vsel %vm1545_vm9, %v1527_v56, %v1179_v61  ;;  %v1528_v14 = vsel %vm1512_vm8, %v1495_v27, %v1079_v63  ;;  %v1364_v63 = vsel %vm1347_vm3, %v3037_v37, %v3453_v52  ;;  %v1365_v37 = vsel %vm1347_vm3, %v3046_v44, %v3472_v24  ;;  %v3610_v24 = vld [vmem:[%s2664_s28 + $0x158] sm:$0xff]  ;;  %v333_v56 = vld [vmem:[%s2664_s28 + $0x160] sm:$0x3] }
 0x187   : > { %1094 = vrot.lane.b32.xlu1 %v3483_v51, %s2601_s14  ;;  %1092 = vrot.lane.b32.xlu0 %v3491_v55, %s2601_s14  ;;  %v463_v1 = vrot.slane %v3610_v24, 1 }
 0x189   : > { %v882_v17 = vpop.permute.xlu1 %881  ;;  %v3518_v49 = vpop.permute.xlu0 %781 }
 0x18b   : > { %v2447_v45 = vpop.f32.mrb[0].mxu0  ;;  %1196 = vrot.lane.b32.xlu1 %v3507_v7, %s2602_s19  ;;  %1194 = vrot.lane.b32.xlu0 %v3512_v20, %s2602_s19 }
 0x18c   : > { %v1950_v9 = vmul.f32 %v2447_v45, %v3523_v26  ;;  %v1783_v13 = vpop.f32.mrb[1].mxu0  ;;  %v3613_v45 = vld [vmem:[%s2664_s28 + $0x150] sm:$0xff] }
 0x18d   : > { %v1949_v23 = vmul.f32 %v3523_v26, %v1783_v13  ;;  %v1280_v57 = vpop.permute.xlu1 %1279  ;;  %v1181_v31 = vpop.permute.xlu0 %1180  ;;  %v639_v62 = vrot.slane %v3613_v45, 2 }
 0x18e   : > { %v1989_v28 = vadd.f32 %v3531_v0, %v1950_v9  ;;  %v1593_v3 = vsel %vm1578_vm10, %v1560_v53, %v1280_v57  ;;  %v1561_v61 = vsel %vm1545_vm9, %v1528_v14, %v1181_v31  ;;  %v465_v53 = vrot.slane %v333_v56, 1 }
 0x18f   : > { %v1988_v59 = vadd.f32 %v3531_v0, %v1949_v23  ;;  %520 = vrot.lane.b32.xlu1 %v3413_v30, %s2598_s7  ;;  %1295 = vrot.lane.b32.xlu0 %v3540_v60, %s2603_s26  ;;  %v462_v23 = vrot.slane %v3613_v45, 1  ;;  %v642_v14 = vrot.slane %v333_v56, 2 }
 0x190   : > { %2466 = vmatprep.mubr.msk.f32.mxu0 %vm1616_vm11, %v1593_v3  ;;  %vm2021_vm12 = vcmp.gt.f32.partialorder %v1989_v28, 0.0  ;;  %v2053_v10 = vmul.f32 0.1, %v1989_v28  ;;  %v3635_v36 = vsel %vm391_vm1, %v463_v1, %v465_v53  ;;  %v3695_v53 = vld [vmem:[%s2664_s28 + $0x170] sm:$0xff] }
 0x191   : > { %v983_v40 = vpop.permute.xlu1 %982  ;;  %v884_v8 = vpop.permute.xlu0 %883  ;;  %vm2020_vm13 = vcmp.gt.f32.partialorder %v1988_v59, 0.0  ;;  %v2052_v30 = vmul.f32 0.1, %v1988_v59 }
 0x192   : > { %v3564_v32 = vsel %vm2021_vm12, %v1989_v28, %v2053_v10  ;;  %v640_v10 = vrot.slane %v3610_v24, 2 }
 0x193   : > { %522 = vrot.lane.b32.xlu1 %v3408_v19, %s2598_s7  ;;  %1297 = vrot.lane.b32.xlu0 %v3558_v12, %s2603_s26  ;;  %v3571_v54 = vsel %vm2020_vm13, %v1988_v59, %v2052_v30  ;;  %v3638_v59 = vsel %vm391_vm1, %v462_v23, %v463_v1  ;;  %v336_v23 = vld [vmem:[%s2664_s28 + $0x178] sm:$0x3] }
 0x194   : > { %v2503_v50 = vpack.c.bf16 %v3564_v32, %v3571_v54  ;;  %v3648_v27 = vsel %vm568_vm0, %v639_v62, %v640_v10  ;;  %v468_v62 = vrot.slane %v3695_v53, 1 }
 0x195   : > { %v985_v16 = vpop.permute.xlu1 %984  ;;  %v1282_v5 = vpop.permute.xlu0 %1281 }
 0x196   : > { %v1594_v18 = vsel %vm1578_vm10, %v1561_v61, %v1282_v5 }
 0x197   : > { %699 = vrot.lane.b32.xlu1 %v3447_v41, %s2597_s30  ;;  %697 = vrot.lane.b32.xlu0 %v3432_v48, %s2597_s30  ;;  %v1397_v41 = vsel %vm1380_vm4, %v1364_v63, %v3470_v21  ;;  %v1398_v21 = vsel %vm1380_vm4, %v1365_v37, %v3488_v15  ;;  %v3658_v63 = vsel %vm568_vm0, %v640_v10, %v642_v14  ;;  %v470_v10 = vrot.slane %v336_v23, 1 }
 0x198   : > { %2467 = vmatmul.mubr.msk.f32.gmra.mrb[14].mxu0 %vm1616_vm11, %v1594_v18  ;;  %v1430_v48 = vsel %vm1413_vm5, %v1397_v41, %v3486_v35 }
 0x199   : > { %v1083_v19 = vpop.permute.xlu1 %1082  ;;  %v1081_v6 = vpop.permute.xlu0 %1080  ;;  %v1463_v43 = vsel %vm1446_vm6, %v1430_v48, %v882_v17  ;;  %v1431_v17 = vsel %vm1413_vm5, %v1398_v21, %v3518_v49  ;;  %v3720_v14 = vsel %vm391_vm1, %v468_v62, %v470_v10 }
 0x19a   : > { %v1496_v52 = vsel %vm1479_vm7, %v1463_v43, %v983_v40  ;;  %v1464_v9 = vsel %vm1446_vm6, %v1431_v17, %v884_v8 }
 0x19b   : > { %797 = vrot.lane.b32.xlu1 %v3483_v51, %s2596_s29  ;;  %795 = vrot.lane.b32.xlu0 %v3491_v55, %s2596_s29  ;;  %v1529_v35 = vsel %vm1512_vm8, %v1496_v52, %v1081_v6  ;;  %v1497_v15 = vsel %vm1479_vm7, %v1464_v9, %v985_v16 }
 0x19c   : > { %v1530_v49 = vsel %vm1512_vm8, %v1497_v15, %v1083_v19 }
 0x19d   : > { %v1185_v22 = vpop.permute.xlu1 %1184  ;;  %v1183_v25 = vpop.permute.xlu0 %1182 }
 0x19e   : > { %v1562_v46 = vsel %vm1545_vm9, %v1529_v35, %v1183_v25  ;;  %v1563_v57 = vsel %vm1545_vm9, %v1530_v49, %v1185_v22 }
 0x19f   : > { %899 = vrot.lane.b32.xlu1 %v3507_v7, %s2599_s8  ;;  %897 = vrot.lane.b32.xlu0 %v3512_v20, %s2599_s8 }
 0x1a1   : > { %v509_v33 = vpop.permute.xlu1 %508  ;;  %v1284_v44 = vpop.permute.xlu0 %1283 }
 0x1a2   : > { %v1595_v13 = vsel %vm1578_vm10, %v1562_v46, %v1284_v44 }
 0x1a3   : > { %1000 = vrot.lane.b32.xlu1 %v3558_v12, %s2600_s9  ;;  %998 = vrot.lane.b32.xlu0 %v3540_v60, %s2600_s9 }
 0x1a4   : > { %2469 = vmatprep.mubr.msk.f32.mxu0 %vm1616_vm11, %v1595_v13 }
 0x1a5   : > { %v511_v31 = vpop.permute.xlu1 %510  ;;  %v1286_v28 = vpop.permute.xlu0 %1285 }
 0x1a6   : > { %v1596_v3 = vsel %vm1578_vm10, %v1563_v57, %v1286_v28 }
 0x1a7   : > { %1098 = vrot.lane.b32.xlu1 %v3610_v24, %s2601_s14  ;;  %1096 = vrot.lane.b32.xlu0 %v3613_v45, %s2601_s14 }
 0x1a8   : > { %2470 = vmatmul.mubr.msk.f32.gmra.mrb[16].mxu0 %vm1616_vm11, %v1596_v3 }
 0x1a9   : > { %v688_v2 = vpop.permute.xlu1 %687  ;;  %v686_v40 = vpop.permute.xlu0 %685 }
 0x1ab   : > { %v2450_v8 = vpop.f32.mrb[2].mxu0  ;;  %1200 = vrot.lane.b32.xlu1 %v3635_v36, %s2602_s19  ;;  %1198 = vrot.lane.b32.xlu0 %v3638_v59, %s2602_s19 }
 0x1ac   : > { %v1952_v30 = vmul.f32 %v2450_v8, %v3523_v26  ;;  %v1793_v47 = vpop.f32.mrb[3].mxu0 }
 0x1ad   : > { %v1951_v61 = vmul.f32 %v3523_v26, %v1793_v47  ;;  %v786_v16 = vpop.permute.xlu1 %785  ;;  %v784_v5 = vpop.permute.xlu0 %783 }
 0x1ae   : > { %v1991_v18 = vadd.f32 %v3531_v0, %v1952_v30 }
 0x1af   : > { %v1990_v19 = vadd.f32 %v3531_v0, %v1951_v61  ;;  %524 = vrot.lane.b32.xlu1 %v3512_v20, %s2598_s7  ;;  %1299 = vrot.lane.b32.xlu0 %v3648_v27, %s2603_s26 }
 0x1b0   : > { %vm2023_vm14 = vcmp.gt.f32.partialorder %v1991_v18, 0.0  ;;  %v2055_v6 = vmul.f32 0.1, %v1991_v18 }
 0x1b1   : > { %vm2022_vm15 = vcmp.gt.f32.partialorder %v1990_v19, 0.0  ;;  %v2054_v41 = vmul.f32 0.1, %v1990_v19  ;;  %v888_v48 = vpop.permute.xlu1 %887  ;;  %v886_v22 = vpop.permute.xlu0 %885 }
 0x1b2   : > { %v3660_v25 = vsel %vm2023_vm14, %v1991_v18, %v2055_v6 }
 0x1b3   : > { %526 = vrot.lane.b32.xlu1 %v3507_v7, %s2598_s7  ;;  %1301 = vrot.lane.b32.xlu0 %v3658_v63, %s2603_s26  ;;  %v3666_v20 = vsel %vm2022_vm15, %v1990_v19, %v2054_v41  ;;  %v1366_v7 = vsel %vm1347_vm3, %v3116_v29, %v509_v33  ;;  %v1367_v29 = vsel %vm1347_vm3, %v3125_v38, %v511_v31  ;;  %v3698_v38 = vld [vmem:[%s2664_s28 + $0x168] sm:$0xff] }
 0x1b4   : > { %v2507_v43 = vpack.c.bf16 %v3660_v25, %v3666_v20  ;;  %v1399_v17 = vsel %vm1380_vm4, %v1366_v7, %v686_v40  ;;  %v1400_v56 = vsel %vm1380_vm4, %v1367_v29, %v688_v2  ;;  %v467_v2 = vrot.slane %v3698_v38, 1 }
 0x1b5   : > { %v989_v37 = vpop.permute.xlu1 %988  ;;  %v987_v52 = vpop.permute.xlu0 %986  ;;  %v1433_v13 = vsel %vm1413_vm5, %v1400_v56, %v786_v16  ;;  %v644_v16 = vrot.slane %v3698_v38, 2 }
 0x1b6   : > { %v1466_v57 = vsel %vm1446_vm6, %v1433_v13, %v888_v48  ;;  %v3723_v61 = vsel %vm391_vm1, %v467_v2, %v468_v62 }
 0x1b7   : > { %703 = vrot.lane.b32.xlu1 %v3558_v12, %s2597_s30  ;;  %701 = vrot.lane.b32.xlu0 %v3540_v60, %s2597_s30  ;;  %v1432_v12 = vsel %vm1413_vm5, %v1399_v17, %v784_v5  ;;  %v1499_v28 = vsel %vm1479_vm7, %v1466_v57, %v989_v37  ;;  %v645_v5 = vrot.slane %v3695_v53, 2  ;;  %v647_v37 = vrot.slane %v336_v23, 2 }
 0x1b8   : > { %v1465_v44 = vsel %vm1446_vm6, %v1432_v12, %v886_v22 }
 0x1b9   : > { %v1087_v21 = vpop.permute.xlu1 %1086  ;;  %v1085_v35 = vpop.permute.xlu0 %1084  ;;  %v1498_v33 = vsel %vm1479_vm7, %v1465_v44, %v987_v52  ;;  %v3733_v22 = vsel %vm568_vm0, %v644_v16, %v645_v5 }
 0x1ba   : > { %v1531_v9 = vsel %vm1512_vm8, %v1498_v33, %v1085_v35  ;;  %v1532_v3 = vsel %vm1512_vm8, %v1499_v28, %v1087_v21 }
 0x1bb   : > { %801 = vrot.lane.b32.xlu1 %v3610_v24, %s2596_s29  ;;  %799 = vrot.lane.b32.xlu0 %v3613_v45, %s2596_s29 }
 0x1bd   : > { %v1189_v46 = vpop.permute.xlu1 %1188  ;;  %v1187_v60 = vpop.permute.xlu0 %1186 }
 0x1be   : > { %v1564_v15 = vsel %vm1545_vm9, %v1531_v9, %v1187_v60  ;;  %v1565_v40 = vsel %vm1545_vm9, %v1532_v3, %v1189_v46  ;;  %v3743_v46 = vsel %vm568_vm0, %v645_v5, %v647_v37 }
 0x1bf   : > { %903 = vrot.lane.b32.xlu1 %v3635_v36, %s2599_s8  ;;  %901 = vrot.lane.b32.xlu0 %v3638_v59, %s2599_s8 }
 0x1c1   : > { %v513_v49 = vpop.permute.xlu1 %512  ;;  %v1288_v1 = vpop.permute.xlu0 %1287 }
 0x1c2   : > { %v1597_v31 = vsel %vm1578_vm10, %v1564_v15, %v1288_v1 }
 0x1c3   : > { %1004 = vrot.lane.b32.xlu1 %v3658_v63, %s2600_s9  ;;  %1002 = vrot.lane.b32.xlu0 %v3648_v27, %s2600_s9 }
 0x1c4   : > { %2472 = vmatprep.mubr.msk.f32.mxu0 %vm1616_vm11, %v1597_v31 }
 0x1c5   : > { %v515_v8 = vpop.permute.xlu1 %514  ;;  %v1290_v30 = vpop.permute.xlu0 %1289 }
 0x1c6   : > { %v1598_v47 = vsel %vm1578_vm10, %v1565_v40, %v1290_v30  ;;  %v338_v30 = vld [vmem:[%s2664_s28 + $0x188] sm:$0xff] }
 0x1c7   : > { %1102 = vrot.lane.b32.xlu1 %v3695_v53, %s2601_s14  ;;  %1100 = vrot.lane.b32.xlu0 %v3698_v38, %s2601_s14 }
 0x1c8   : > { %2473 = vmatmul.mubr.msk.f32.gmra.mrb[18].mxu0 %vm1616_vm11, %v1598_v47 }
 0x1c9   : > { %v692_v18 = vpop.permute.xlu1 %691  ;;  %v690_v19 = vpop.permute.xlu0 %689 }
 0x1cb   : > { %v2453_v6 = vpop.f32.mrb[4].mxu0  ;;  %1204 = vrot.lane.b32.xlu1 %v3720_v14, %s2602_s19  ;;  %1202 = vrot.lane.b32.xlu0 %v3723_v61, %s2602_s19 }
 0x1cc   : > { %v1954_v41 = vmul.f32 %v2453_v6, %v3523_v26  ;;  %v1803_v48 = vpop.f32.mrb[5].mxu0 }
 0x1cd   : > { %v1953_v52 = vmul.f32 %v3523_v26, %v1803_v48  ;;  %v790_v21 = vpop.permute.xlu1 %789  ;;  %v788_v35 = vpop.permute.xlu0 %787 }
 0x1ce   : > { %v1993_v7 = vadd.f32 %v3531_v0, %v1954_v41 }
 0x1cf   : > { %v1992_v17 = vadd.f32 %v3531_v0, %v1953_v52  ;;  %528 = vrot.lane.b32.xlu1 %v3638_v59, %s2598_s7  ;;  %1303 = vrot.lane.b32.xlu0 %v3733_v22, %s2603_s26 }
 0x1d0   : > { %vm2025_vm2 = vcmp.gt.f32.partialorder %v1993_v7, 0.0  ;;  %v2057_v12 = vmul.f32 0.1, %v1993_v7 }
 0x1d1   : > { %vm2024_vm12 = vcmp.gt.f32.partialorder %v1992_v17, 0.0  ;;  %v2056_v60 = vmul.f32 0.1, %v1992_v17  ;;  %v892_v44 = vpop.permute.xlu1 %891  ;;  %v890_v29 = vpop.permute.xlu0 %889 }
 0x1d2   : > { %v3745_v33 = vsel %vm2025_vm2, %v1993_v7, %v2057_v12 }
 0x1d3   : > { %530 = vrot.lane.b32.xlu1 %v3635_v36, %s2598_s7  ;;  %1305 = vrot.lane.b32.xlu0 %v3743_v46, %s2603_s26  ;;  %v3751_v59 = vsel %vm2024_vm12, %v1992_v17, %v2056_v60  ;;  %v1368_v36 = vsel %vm1347_vm3, %v3198_v11, %v513_v49  ;;  %v1369_v11 = vsel %vm1347_vm3, %v3190_v42, %v515_v8  ;;  %v337_v42 = vld [vmem:[%s2664_s28 + $0x180] sm:$0xff]  ;;  %v339_v8 = vld [vmem:[%s2664_s28 + $0x190] sm:$0x3] }
 0x1d4   : > { %v2511_v56 = vpack.c.bf16 %v3745_v33, %v3751_v59  ;;  %v1401_v23 = vsel %vm1380_vm4, %v1368_v36, %v690_v19  ;;  %v1402_v28 = vsel %vm1380_vm4, %v1369_v11, %v692_v18  ;;  %v845_v19 = vrot.slane %v338_v30, 1  ;;  %v4019_v33 = vld [vmem:[%s4086_s4] sm:$0xff] }
 0x1d5   : > { %v993_v9 = vpop.permute.xlu1 %992  ;;  %v991_v13 = vpop.permute.xlu0 %990  ;;  %v1435_v62 = vsel %vm1413_vm5, %v1402_v28, %v790_v21  ;;  %v844_v6 = vrot.slane %v337_v42, 1  ;;  %v847_v41 = vrot.slane %v339_v8, 1  ;;  %v945_v7 = vrot.slane %v337_v42, 2  ;;  %2429 = vmatprep.mubr.f32.mxu1 %v4019_v33 }
 0x1d6   : > { %v1468_v47 = vsel %vm1446_vm6, %v1435_v62, %v892_v44 }
 0x1d7   : > { %707 = vrot.lane.b32.xlu1 %v3658_v63, %s2597_s30  ;;  %705 = vrot.lane.b32.xlu0 %v3648_v27, %s2597_s30  ;;  %v1434_v63 = vsel %vm1413_vm5, %v1401_v23, %v788_v35  ;;  %v1501_v5 = vsel %vm1479_vm7, %v1468_v47, %v993_v9  ;;  %v946_v35 = vrot.slane %v338_v30, 2  ;;  %v848_v17 = vsel %vm391_vm1, %v845_v19, %v847_v41 }
 0x1d8   : > { %v1467_v31 = vsel %vm1446_vm6, %v1434_v63, %v890_v29  ;;  %v846_v12 = vsel %vm391_vm1, %v844_v6, %v845_v19 }
 0x1d9   : > { %v1091_v15 = vpop.permute.xlu1 %1090  ;;  %v1089_v1 = vpop.permute.xlu0 %1088  ;;  %v1500_v49 = vsel %vm1479_vm7, %v1467_v31, %v991_v13 }
 0x1da   : > { %v1533_v3 = vsel %vm1512_vm8, %v1500_v49, %v1089_v1  ;;  %v1534_v18 = vsel %vm1512_vm8, %v1501_v5, %v1091_v15  ;;  %v947_v15 = vsel %vm568_vm0, %v945_v7, %v946_v35  ;;  %v948_v1 = vrot.slane %v339_v8, 2  ;;  %v342_v7 = vld [vmem:[%s2664_s28 + $0x1a8] sm:$0x3] }
 0x1db   : > { %805 = vrot.lane.b32.xlu1 %v3695_v53, %s2596_s29  ;;  %803 = vrot.lane.b32.xlu0 %v3698_v38, %s2596_s29 }
 0x1dc   : > { %v949_v11 = vsel %vm568_vm0, %v946_v35, %v948_v1  ;;  %v340_v35 = vld [vmem:[%s2664_s28 + $0x198] sm:$0xff] }
 0x1dd   : > { %v1193_v57 = vpop.permute.xlu1 %1192  ;;  %v1191_v27 = vpop.permute.xlu0 %1190 }
 0x1de   : > { %v1566_v10 = vsel %vm1545_vm9, %v1533_v3, %v1191_v27  ;;  %v1567_v48 = vsel %vm1545_vm9, %v1534_v18, %v1193_v57 }
 0x1df   : > { %907 = vrot.lane.b32.xlu1 %v3720_v14, %s2599_s8  ;;  %905 = vrot.lane.b32.xlu0 %v3723_v61, %s2599_s8 }
 0x1e1   : > { %v517_v2 = vpop.permute.xlu1 %516  ;;  %v1292_v40 = vpop.permute.xlu0 %1291 }
 0x1e2   : > { %v1599_v16 = vsel %vm1578_vm10, %v1566_v10, %v1292_v40 }
 0x1e3   : > { %1008 = vrot.lane.b32.xlu1 %v3743_v46, %s2600_s9  ;;  %1006 = vrot.lane.b32.xlu0 %v3733_v22, %s2600_s9 }
 0x1e4   : > { %2475 = vmatprep.mubr.msk.f32.mxu0 %vm1616_vm11, %v1599_v16 }
 0x1e5   : > { %v519_v37 = vpop.permute.xlu1 %518  ;;  %v1294_v52 = vpop.permute.xlu0 %1293 }
 0x1e6   : > { %v1600_v21 = vsel %vm1578_vm10, %v1567_v48, %v1294_v52  ;;  %v1371_v6 = vsel %vm1347_vm3, %v3285_v34, %v519_v37 }
 0x1e7   : > { %1106 = vrot.lane.b32.xlu1 %v338_v30, %s2601_s14  ;;  %1104 = vrot.lane.b32.xlu0 %v337_v42, %s2601_s14 }
 0x1e8   : > { %2476 = vmatmul.mubr.msk.f32.gmra.mrb[20].mxu0 %vm1616_vm11, %v1600_v21  ;;  %v341_v21 = vld [vmem:[%s2664_s28 + $0x1a0] sm:$0xff] }
 0x1e9   : > { %v696_v60 = vpop.permute.xlu1 %695  ;;  %v694_v44 = vpop.permute.xlu0 %693 }
 0x1eb   : > { %v2456_v29 = vpop.f32.mrb[6].mxu0  ;;  %1208 = vrot.lane.b32.xlu1 %v848_v17, %s2602_s19  ;;  %1206 = vrot.lane.b32.xlu0 %v846_v12, %s2602_s19 }
 0x1ec   : > { %v1956_v9 = vmul.f32 %v2456_v29, %v3523_v26  ;;  %v1813_v13 = vpop.f32.mrb[7].mxu0  ;;  %v1148_v29 = vrot.slane %v342_v7, 1 }
 0x1ed   : > { %v1955_v36 = vmul.f32 %v3523_v26, %v1813_v13  ;;  %v794_v23 = vpop.permute.xlu1 %793  ;;  %v792_v63 = vpop.permute.xlu0 %791 }
 0x1ee   : > { %v1995_v57 = vadd.f32 %v3531_v0, %v1956_v9 }
 0x1ef   : > { %v1994_v27 = vadd.f32 %v3531_v0, %v1955_v36  ;;  %532 = vrot.lane.b32.xlu1 %v3723_v61, %s2598_s7  ;;  %1307 = vrot.lane.b32.xlu0 %v947_v15, %s2603_s26 }
 0x1f0   : > { %vm2027_vm13 = vcmp.gt.f32.partialorder %v1995_v57, 0.0  ;;  %v2059_v31 = vmul.f32 0.1, %v1995_v57 }
 0x1f1   : > { %vm2026_vm14 = vcmp.gt.f32.partialorder %v1994_v27, 0.0  ;;  %v2058_v49 = vmul.f32 0.1, %v1994_v27  ;;  %v896_v28 = vpop.permute.xlu1 %895  ;;  %v894_v3 = vpop.permute.xlu0 %893 }
 0x1f2   : > { %v3809_v62 = vsel %vm2027_vm13, %v1995_v57, %v2059_v31 }
 0x1f3   : > { %534 = vrot.lane.b32.xlu1 %v3720_v14, %s2598_s7  ;;  %1309 = vrot.lane.b32.xlu0 %v949_v11, %s2603_s26  ;;  %v3814_v10 = vsel %vm2026_vm14, %v1994_v27, %v2058_v49  ;;  %v1370_v14 = vsel %vm1347_vm3, %v3293_v4, %v517_v2  ;;  %v1404_v2 = vsel %vm1380_vm4, %v1371_v6, %v696_v60  ;;  %v1146_v60 = vrot.slane %v341_v21, 1 }
 0x1f4   : > { %v2515_v61 = vpack.c.bf16 %v3809_v62, %v3814_v10  ;;  %v1403_v5 = vsel %vm1380_vm4, %v1370_v14, %v694_v44  ;;  %v1145_v44 = vrot.slane %v340_v35, 1  ;;  %v1249_v27 = vrot.slane %v342_v7, 2 }
 0x1f5   : > { %v997_v40 = vpop.permute.xlu1 %996  ;;  %v995_v8 = vpop.permute.xlu0 %994  ;;  %v1436_v18 = vsel %vm1413_vm5, %v1403_v5, %v792_v63  ;;  %v1246_v63 = vrot.slane %v340_v35, 2 }
 0x1f6   : > { %v1147_v57 = vsel %vm391_vm1, %v1145_v44, %v1146_v60 }
 0x1f7   : > { %711 = vrot.lane.b32.xlu1 %v3743_v46, %s2597_s30  ;;  %709 = vrot.lane.b32.xlu0 %v3733_v22, %s2597_s30  ;;  %v1469_v22 = vsel %vm1446_vm6, %v1436_v18, %v894_v3 }
 0x1f8   : > { %v1502_v4 = vsel %vm1479_vm7, %v1469_v22, %v995_v8 }
 0x1f9   : > { %v1095_v47 = vpop.permute.xlu1 %1094  ;;  %v1093_v16 = vpop.permute.xlu0 %1092 }
 0x1fb   : > { %809 = vrot.lane.b32.xlu1 %v338_v30, %s2596_s29  ;;  %807 = vrot.lane.b32.xlu0 %v337_v42, %s2596_s29  ;;  %v1535_v30 = vsel %vm1512_vm8, %v1502_v4, %v1093_v16  ;;  %v1437_v42 = vsel %vm1413_vm5, %v1404_v2, %v794_v23  ;;  %v1247_v23 = vrot.slane %v341_v21, 2 }
 0x1fc   : > { %v1470_v34 = vsel %vm1446_vm6, %v1437_v42, %v896_v28 }
 0x1fd   : > { %v1197_v46 = vpop.permute.xlu1 %1196  ;;  %v1195_v19 = vpop.permute.xlu0 %1194  ;;  %v1248_v8 = vsel %vm568_vm0, %v1246_v63, %v1247_v23 }
 0x1fe   : > { %v1568_v41 = vsel %vm1545_vm9, %v1535_v30, %v1195_v19 }
 0x1ff   : > { %911 = vrot.lane.b32.xlu1 %v848_v17, %s2599_s8  ;;  %909 = vrot.lane.b32.xlu0 %v846_v12, %s2599_s8  ;;  %v1503_v17 = vsel %vm1479_vm7, %v1470_v34, %v997_v40  ;;  %v1250_v40 = vsel %vm568_vm0, %v1247_v23, %v1249_v27 }
 0x200   : > { %v1536_v12 = vsel %vm1512_vm8, %v1503_v17, %v1095_v47 }
 0x201   : > { %v521_v48 = vpop.permute.xlu1 %520  ;;  %v1296_v52 = vpop.permute.xlu0 %1295  ;;  %v1569_v9 = vsel %vm1545_vm9, %v1536_v12, %v1197_v46 }
 0x202   : > { %v1601_v37 = vsel %vm1578_vm10, %v1568_v41, %v1296_v52 }
 0x203   : > { %1012 = vrot.lane.b32.xlu1 %v949_v11, %s2600_s9  ;;  %1010 = vrot.lane.b32.xlu0 %v947_v15, %s2600_s9  ;;  %v1149_v15 = vsel %vm391_vm1, %v1146_v60, %v1148_v29 }
 0x204   : > { %2478 = vmatprep.mubr.msk.f32.mxu0 %vm1616_vm11, %v1601_v37 }
 0x205   : > { %v523_v13 = vpop.permute.xlu1 %522  ;;  %v1298_v1 = vpop.permute.xlu0 %1297 }
 0x206   : > { %v1602_v36 = vsel %vm1578_vm10, %v1569_v9, %v1298_v1  ;;  %v1373_v60 = vsel %vm1347_vm3, %v3384_v39, %v523_v13 }
 0x207   : > { %1110 = vrot.lane.b32.xlu1 %v341_v21, %s2601_s14  ;;  %1108 = vrot.lane.b32.xlu0 %v340_v35, %s2601_s14  ;;  %v1372_v35 = vsel %vm1347_vm3, %v3392_v58, %v521_v48 }
 0x208   : > { %2479 = vmatmul.mubr.msk.f32.gmra.mrb[22].mxu0 %vm1616_vm11, %v1602_v36 }
 0x209   : > { %v700_v31 = vpop.permute.xlu1 %699  ;;  %v698_v11 = vpop.permute.xlu0 %697 }
 0x20a   : > { %v1405_v7 = vsel %vm1380_vm4, %v1372_v35, %v698_v11  ;;  %v1406_v29 = vsel %vm1380_vm4, %v1373_v60, %v700_v31 }
 0x20b   : > { %v2459_v49 = vpop.f32.mrb[8].mxu0  ;;  %1212 = vrot.lane.b32.xlu1 %v1149_v15, %s2602_s19  ;;  %1210 = vrot.lane.b32.xlu0 %v1147_v57, %s2602_s19 }
 0x20c   : > { %v1958_v28 = vmul.f32 %v2459_v49, %v3523_v26  ;;  %v1823_v3 = vpop.f32.mrb[9].mxu0 }
 0x20d   : > { %v1957_v47 = vmul.f32 %v3523_v26, %v1823_v3  ;;  %v798_v16 = vpop.permute.xlu1 %797  ;;  %v796_v14 = vpop.permute.xlu0 %795 }
 0x20e   : > { %v1997_v5 = vadd.f32 %v3531_v0, %v1958_v28  ;;  %v1438_v34 = vsel %vm1413_vm5, %v1405_v7, %v796_v14  ;;  %v1439_v1 = vsel %vm1413_vm5, %v1406_v29, %v798_v16 }
 0x20f   : > { %v1996_v18 = vadd.f32 %v3531_v0, %v1957_v47  ;;  %1313 = vrot.lane.b32.xlu1 %v1250_v40, %s2603_s26  ;;  %1311 = vrot.lane.b32.xlu0 %v1248_v8, %s2603_s26 }
 0x210   : > { %vm2029_vm1 = vcmp.gt.f32.partialorder %v1997_v5, 0.0  ;;  %v2061_v46 = vmul.f32 0.1, %v1997_v5 }
 0x211   : > { %vm2028_vm15 = vcmp.gt.f32.partialorder %v1996_v18, 0.0  ;;  %v2060_v19 = vmul.f32 0.1, %v1996_v18  ;;  %v900_v22 = vpop.permute.xlu1 %899  ;;  %v898_v6 = vpop.permute.xlu0 %897 }
 0x212   : > { %v3865_v4 = vsel %vm2029_vm1, %v1997_v5, %v2061_v46  ;;  %v1471_v12 = vsel %vm1446_vm6, %v1438_v34, %v898_v6  ;;  %v1472_v23 = vsel %vm1446_vm6, %v1439_v1, %v900_v22 }
 0x213   : > { %v3867_v2 = vsel %vm2028_vm15, %v1996_v18, %v2060_v19 }
 0x214   : > { %v2519_v30 = vpack.c.bf16 %v3865_v4, %v3867_v2 }
 0x215   : > { %v1001_v42 = vpop.permute.xlu1 %1000  ;;  %v999_v41 = vpop.permute.xlu0 %998 }
 0x216   : > { %v1504_v44 = vsel %vm1479_vm7, %v1471_v12, %v999_v41  ;;  %v1505_v15 = vsel %vm1479_vm7, %v1472_v23, %v1001_v42 }
 0x219   : > { %v1099_v52 = vpop.permute.xlu1 %1098  ;;  %v1097_v21 = vpop.permute.xlu0 %1096 }
 0x21a   : > { %v1537_v9 = vsel %vm1512_vm8, %v1504_v44, %v1097_v21  ;;  %v1538_v39 = vsel %vm1512_vm8, %v1505_v15, %v1099_v52 }
 0x21d   : > { %v1201_v37 = vpop.permute.xlu1 %1200  ;;  %v1199_v17 = vpop.permute.xlu0 %1198 }
 0x21e   : > { %v1570_v58 = vsel %vm1545_vm9, %v1537_v9, %v1199_v17  ;;  %v1571_v13 = vsel %vm1545_vm9, %v1538_v39, %v1201_v37 }
 0x221   : > { %v525_v48 = vpop.permute.xlu1 %524  ;;  %v1300_v36 = vpop.permute.xlu0 %1299 }
 0x222   : > { %v1603_v63 = vsel %vm1578_vm10, %v1570_v58, %v1300_v36  ;;  %v1374_v34 = vsel %vm1347_vm3, %v3491_v55, %v525_v48 }
 0x223   : > { %2481 = vmatprep.mubr.msk.f32.mxu0 %vm1616_vm11, %v1603_v63 }
 0x225   : > { %v527_v57 = vpop.permute.xlu1 %526  ;;  %v1302_v27 = vpop.permute.xlu0 %1301 }
 0x226   : > { %v1604_v31 = vsel %vm1578_vm10, %v1571_v13, %v1302_v27  ;;  %v1375_v29 = vsel %vm1347_vm3, %v3483_v51, %v527_v57 }
 0x227   : > { %2482 = vmatmul.mubr.msk.f32.gmra.mrb[24].mxu0 %vm1616_vm11, %v1604_v31 }
 0x229   : > { %v704_v11 = vpop.permute.xlu1 %703  ;;  %v702_v49 = vpop.permute.xlu0 %701 }
 0x22a   : > { %v1407_v37 = vsel %vm1380_vm4, %v1374_v34, %v702_v49  ;;  %v1408_v1 = vsel %vm1380_vm4, %v1375_v29, %v704_v11 }
 0x22b   : > { %v2462_v28 = vpop.f32.mrb[10].mxu0 }
 0x22c   : > { %v1960_v3 = vmul.f32 %v2462_v28, %v3523_v26  ;;  %v1833_v40 = vpop.f32.mrb[11].mxu0 }
 0x22d   : > { %v1959_v8 = vmul.f32 %v3523_v26, %v1833_v40  ;;  %v802_v47 = vpop.permute.xlu1 %801  ;;  %v800_v16 = vpop.permute.xlu0 %799 }
 0x22e   : > { %v1999_v14 = vadd.f32 %v3531_v0, %v1960_v3  ;;  %v1440_v17 = vsel %vm1413_vm5, %v1407_v37, %v800_v16  ;;  %v1441_v36 = vsel %vm1413_vm5, %v1408_v1, %v802_v47 }
 0x22f   : > { %v1998_v5 = vadd.f32 %v3531_v0, %v1959_v8 }
 0x230   : > { %vm2031_vm0 = vcmp.gt.f32.partialorder %v1999_v14, 0.0  ;;  %v2063_v18 = vmul.f32 0.1, %v1999_v14 }
 0x231   : > { %vm2030_vm2 = vcmp.gt.f32.partialorder %v1998_v5, 0.0  ;;  %v2062_v46 = vmul.f32 0.1, %v1998_v5  ;;  %v904_v19 = vpop.permute.xlu1 %903  ;;  %v902_v22 = vpop.permute.xlu0 %901 }
 0x232   : > { %v3895_v6 = vsel %vm2031_vm0, %v1999_v14, %v2063_v18  ;;  %v1473_v44 = vsel %vm1446_vm6, %v1440_v17, %v902_v22  ;;  %v1474_v63 = vsel %vm1446_vm6, %v1441_v36, %v904_v19 }
 0x233   : > { %v3897_v42 = vsel %vm2030_vm2, %v1998_v5, %v2062_v46 }
 0x234   : > { %v2523_v41 = vpack.c.bf16 %v3895_v6, %v3897_v42 }
 0x235   : > { %v1005_v52 = vpop.permute.xlu1 %1004  ;;  %v1003_v21 = vpop.permute.xlu0 %1002 }
 0x236   : > { %v1506_v9 = vsel %vm1479_vm7, %v1473_v44, %v1003_v21  ;;  %v1507_v39 = vsel %vm1479_vm7, %v1474_v63, %v1005_v52 }
 0x239   : > { %v1103_v35 = vpop.permute.xlu1 %1102  ;;  %v1101_v7 = vpop.permute.xlu0 %1100 }
 0x23a   : > { %v1539_v58 = vsel %vm1512_vm8, %v1506_v9, %v1101_v7  ;;  %v1540_v51 = vsel %vm1512_vm8, %v1507_v39, %v1103_v35 }
 0x23d   : > { %v1205_v12 = vpop.permute.xlu1 %1204  ;;  %v1203_v60 = vpop.permute.xlu0 %1202 }
 0x23e   : > { %v1572_v55 = vsel %vm1545_vm9, %v1539_v58, %v1203_v60  ;;  %v1573_v13 = vsel %vm1545_vm9, %v1540_v51, %v1205_v12 }
 0x241   : > { %v529_v48 = vpop.permute.xlu1 %528  ;;  %v1304_v23 = vpop.permute.xlu0 %1303 }
 0x242   : > { %v1605_v15 = vsel %vm1578_vm10, %v1572_v55, %v1304_v23  ;;  %v1376_v12 = vsel %vm1347_vm3, %v3613_v45, %v529_v48 }
 0x243   : > { %2484 = vmatprep.mubr.msk.f32.mxu0 %vm1616_vm11, %v1605_v15 }
 0x245   : > { %v531_v57 = vpop.permute.xlu1 %530  ;;  %v1306_v27 = vpop.permute.xlu0 %1305 }
 0x246   : > { %v1606_v31 = vsel %vm1578_vm10, %v1573_v13, %v1306_v27  ;;  %v1377_v58 = vsel %vm1347_vm3, %v3610_v24, %v531_v57 }
 0x247   : > { %2485 = vmatmul.mubr.msk.f32.gmra.mrb[26].mxu0 %vm1616_vm11, %v1606_v31 }
 0x249   : > { %v708_v11 = vpop.permute.xlu1 %707  ;;  %v706_v49 = vpop.permute.xlu0 %705 }
 0x24a   : > { %v1409_v60 = vsel %vm1380_vm4, %v1376_v12, %v706_v49  ;;  %v1410_v55 = vsel %vm1380_vm4, %v1377_v58, %v708_v11 }
 0x24b   : > { %v2465_v28 = vpop.f32.mrb[12].mxu0 }
 0x24c   : > { %v1962_v3 = vmul.f32 %v2465_v28, %v3523_v26  ;;  %v1843_v40 = vpop.f32.mrb[13].mxu0 }
 0x24d   : > { %v1961_v8 = vmul.f32 %v3523_v26, %v1843_v40  ;;  %v806_v47 = vpop.permute.xlu1 %805  ;;  %v804_v16 = vpop.permute.xlu0 %803 }
 0x24e   : > { %v2001_v14 = vadd.f32 %v3531_v0, %v1962_v3  ;;  %v1442_v44 = vsel %vm1413_vm5, %v1409_v60, %v804_v16  ;;  %v1443_v63 = vsel %vm1413_vm5, %v1410_v55, %v806_v47 }
 0x24f   : > { %v2000_v5 = vadd.f32 %v3531_v0, %v1961_v8 }
 0x250   : > { %vm2033_vm12 = vcmp.gt.f32.partialorder %v2001_v14, 0.0  ;;  %v2065_v18 = vmul.f32 0.1, %v2001_v14 }
 0x251   : > { %vm2032_vm13 = vcmp.gt.f32.partialorder %v2000_v5, 0.0  ;;  %v2064_v46 = vmul.f32 0.1, %v2000_v5  ;;  %v908_v19 = vpop.permute.xlu1 %907  ;;  %v906_v22 = vpop.permute.xlu0 %905 }
 0x252   : > { %v3925_v52 = vsel %vm2033_vm12, %v2001_v14, %v2065_v18  ;;  %v1475_v1 = vsel %vm1446_vm6, %v1442_v44, %v906_v22  ;;  %v1476_v39 = vsel %vm1446_vm6, %v1443_v63, %v908_v19 }
 0x253   : > { %v3927_v21 = vsel %vm2032_vm13, %v2000_v5, %v2064_v46 }
 0x254   : > { %v2527_v35 = vpack.c.bf16 %v3925_v52, %v3927_v21  ;;  %v2117_v52 = vld [vmem:[%s4086_s4 + $0x8] sm:$0xff]  ;;  %v2118_v21 = vld [vmem:[%s4086_s4 + $0x10] sm:$0x3] }
 0x255   : > { %v1009_v7 = vpop.permute.xlu1 %1008  ;;  %v1007_v34 = vpop.permute.xlu0 %1006 }
 0x256   : > { %v1508_v36 = vsel %vm1479_vm7, %v1475_v1, %v1007_v34  ;;  %v1509_v13 = vsel %vm1479_vm7, %v1476_v39, %v1009_v7 }
 0x259   : > { %v1107_v37 = vpop.permute.xlu1 %1106  ;;  %v1105_v17 = vpop.permute.xlu0 %1104 }
 0x25a   : > { %v1541_v23 = vsel %vm1512_vm8, %v1508_v36, %v1105_v17  ;;  %v1542_v24 = vsel %vm1512_vm8, %v1509_v13, %v1107_v37 }
 0x25d   : > { %v1209_v29 = vpop.permute.xlu1 %1208  ;;  %v1207_v9 = vpop.permute.xlu0 %1206 }
 0x25e   : > { %v1574_v45 = vsel %vm1545_vm9, %v1541_v23, %v1207_v9  ;;  %v1575_v57 = vsel %vm1545_vm9, %v1542_v24, %v1209_v29 }
 0x261   : > { %v533_v48 = vpop.permute.xlu1 %532  ;;  %v1308_v15 = vpop.permute.xlu0 %1307 }
 0x262   : > { %v1607_v51 = vsel %vm1578_vm10, %v1574_v45, %v1308_v15  ;;  %v1378_v9 = vsel %vm1347_vm3, %v3698_v38, %v533_v48 }
 0x263   : > { %2487 = vmatprep.mubr.msk.f32.mxu0 %vm1616_vm11, %v1607_v51 }
 0x265   : > { %v535_v27 = vpop.permute.xlu1 %534  ;;  %v1310_v31 = vpop.permute.xlu0 %1309 }
 0x266   : > { %v1608_v11 = vsel %vm1578_vm10, %v1575_v57, %v1310_v31  ;;  %v1379_v1 = vsel %vm1347_vm3, %v3695_v53, %v535_v27 }
 0x267   : > { %2488 = vmatmul.mubr.msk.f32.gmra.mrb[28].mxu0 %vm1616_vm11, %v1608_v11 }
 0x269   : > { %v712_v49 = vpop.permute.xlu1 %711  ;;  %v710_v28 = vpop.permute.xlu0 %709 }
 0x26a   : > { %v1412_v36 = vsel %vm1380_vm4, %v1379_v1, %v712_v49  ;;  %v1411_v55 = vsel %vm1380_vm4, %v1378_v9, %v710_v28 }
 0x26b   : > { %v2468_v3 = vpop.f32.mrb[14].mxu0 }
 0x26c   : > { %v1964_v40 = vmul.f32 %v2468_v3, %v3523_v26  ;;  %v1853_v8 = vpop.f32.mrb[15].mxu0 }
 0x26d   : > { %v1963_v47 = vmul.f32 %v3523_v26, %v1853_v8  ;;  %v810_v16 = vpop.permute.xlu1 %809  ;;  %v808_v14 = vpop.permute.xlu0 %807 }
 0x26e   : > { %v2003_v5 = vadd.f32 %v3531_v0, %v1964_v40  ;;  %v1445_v45 = vsel %vm1413_vm5, %v1412_v36, %v810_v16  ;;  %v1444_v15 = vsel %vm1413_vm5, %v1411_v55, %v808_v14 }
 0x26f   : > { %v2002_v18 = vadd.f32 %v3531_v0, %v1963_v47 }
 0x270   : > { %vm2035_vm14 = vcmp.gt.f32.partialorder %v2003_v5, 0.0  ;;  %v2067_v46 = vmul.f32 0.1, %v2003_v5 }
 0x271   : > { %vm2034_vm1 = vcmp.gt.f32.partialorder %v2002_v18, 0.0  ;;  %v2066_v19 = vmul.f32 0.1, %v2002_v18  ;;  %v912_v22 = vpop.permute.xlu1 %911  ;;  %v910_v7 = vpop.permute.xlu0 %909 }
 0x272   : > { %v3955_v34 = vsel %vm2035_vm14, %v2003_v5, %v2067_v46  ;;  %v1478_v38 = vsel %vm1446_vm6, %v1445_v45, %v912_v22  ;;  %v1477_v53 = vsel %vm1446_vm6, %v1444_v15, %v910_v7  ;;  %v3991_v46 = vld [vmem:[%s4084_s2] ss:$0 sm:$0xff] }
 0x273   : > { %v3957_v37 = vsel %vm2034_vm1, %v2002_v18, %v2066_v19 }
 0x274   : > { %v2531_v17 = vpack.c.bf16 %v3955_v34, %v3957_v37 }
 0x275   : > { %v1013_v12 = vpop.permute.xlu1 %1012  ;;  %v1011_v60 = vpop.permute.xlu0 %1010 }
 0x276   : > { %v1511_v24 = vsel %vm1479_vm7, %v1478_v38, %v1013_v12  ;;  %v1510_v57 = vsel %vm1479_vm7, %v1477_v53, %v1011_v60  ;;  %v3998_v12 = vld [vmem:[%s4085_s3] ss:$0 sm:$0xff] }
 0x279   : > { %v1111_v44 = vpop.permute.xlu1 %1110  ;;  %v1109_v29 = vpop.permute.xlu0 %1108 }
 0x27a   : > { %v1544_v31 = vsel %vm1512_vm8, %v1511_v24, %v1111_v44  ;;  %v1543_v11 = vsel %vm1512_vm8, %v1510_v57, %v1109_v29 }
 0x27b   : > { %v2471_v58 = vpop.f32.mrb[16].mxu0 }
 0x27c   : > { %v1966_v23 = vmul.f32 %v2471_v58, %v3523_v26  ;;  %v1863_v63 = vpop.f32.mrb[17].mxu0 }
 0x27d   : > { %v1965_v39 = vmul.f32 %v3523_v26, %v1863_v63  ;;  %v1213_v51 = vpop.permute.xlu1 %1212  ;;  %v1211_v13 = vpop.permute.xlu0 %1210 }
 0x27e   : > { %v2005_v48 = vadd.f32 %v3531_v0, %v1966_v23  ;;  %v1577_v49 = vsel %vm1545_vm9, %v1544_v31, %v1213_v51  ;;  %v1576_v28 = vsel %vm1545_vm9, %v1543_v11, %v1211_v13  ;;  %v2120_v11 = vld [vmem:[%s4087_s5 + $0x8] sm:$0xff] }
 0x27f   : > { %v2004_v27 = vadd.f32 %v3531_v0, %v1965_v39 }
 0x280   : > { %vm2037_vm3 = vcmp.gt.f32.partialorder %v2005_v48, 0.0  ;;  %v2069_v26 = vmul.f32 0.1, %v2005_v48 }
 0x281   : > { %v1314_v3 = vpop.permute.xlu1 %1313  ;;  %v1312_v40 = vpop.permute.xlu0 %1311  ;;  %vm2036_vm4 = vcmp.gt.f32.partialorder %v2004_v27, 0.0  ;;  %v2068_v8 = vmul.f32 0.1, %v2004_v27 }
 0x282   : > { %v1610_v47 = vsel %vm1578_vm10, %v1577_v49, %v1314_v3  ;;  %v1609_v16 = vsel %vm1578_vm10, %v1576_v28, %v1312_v40  ;;  %v2101_v14 = vsel %vm2037_vm3, %v2005_v48, %v2069_v26  ;;  %v2604_v26 = vmov 0   ;;  %v2121_v49 = vld [vmem:[%s4087_s5 + $0x10] sm:$0x3] }
 0x283   : > { %2490 = vmatprep.mubr.msk.f32.mxu0 %vm1616_vm11, %v1609_v16  ;;  %v2100_v0 = vsel %vm2036_vm4, %v2004_v27, %v2068_v8  ;;  %2568 = vset.pattern.permute.xlu0 %v2604_v26 }
 0x284   : > { %2491 = vmatmul.mubr.msk.f32.gmra.mrb[30].mxu0 %vm1616_vm11, %v1610_v47  ;;  %v2501_v5 = vpack.c.bf16 %v2101_v14, %v2100_v0  ;;  %2569 = vset.pattern.permute.xlu1 %v2604_v26 }
 0x285   : > { %2129 = vperm.xlu1 %2569, %v2120_v11  }
 0x286   : > { %2502 = vmatprep.subr.bf16.mxu1 %v2501_v5 }
 0x287   : > { %2504 = vmatpush3.bf16.xpose.msra.mxu1 %v2503_v50 }
 0x289   : > { %2134 = vperm.xlu1 %2569, %v2121_v49  }
 0x29b   : > { %v2474_v18 = vpop.f32.mrb[18].mxu0 }
 0x29c   : > { %v1968_v19 = vmul.f32 %v3991_v46, %v2474_v18  ;;  %v1873_v22 = vpop.f32.mrb[19].mxu0 }
 0x29d   : > { %v1967_v7 = vmul.f32 %v3991_v46, %v1873_v22 }
 0x29e   : > { %v2007_v60 = vadd.f32 %v3998_v12, %v1968_v19 }
 0x29f   : > { %v2006_v32 = vadd.f32 %v3998_v12, %v1967_v7 }
 0x2a0   : > { %vm2039_vm5 = vcmp.gt.f32.partialorder %v2007_v60, 0.0  ;;  %v2071_v54 = vmul.f32 0.1, %v2007_v60 }
 0x2a1   : > { %vm2038_vm6 = vcmp.gt.f32.partialorder %v2006_v32, 0.0  ;;  %v2070_v50 = vmul.f32 0.1, %v2006_v32 }
 0x2a2   : > { %v2103_v44 = vsel %vm2039_vm5, %v2007_v60, %v2071_v54 }
 0x2a3   : > { %v2102_v29 = vsel %vm2038_vm6, %v2006_v32, %v2070_v50 }
 0x2a4   : > { %v2505_v9 = vpack.c.bf16 %v2103_v44, %v2102_v29 }
 0x2a6   : > { %2506 = vmatprep.subr.bf16.mxu1 %v2505_v9 }
 0x2a7   : > { %2508 = vmatpush3.bf16.xpose.msra.mxu1 %v2507_v43 }
 0x2bb   : > { %v2477_v1 = vpop.f32.mrb[20].mxu0 }
 0x2bc   : > { %v1970_v58 = vmul.f32 %v3991_v46, %v2477_v1  ;;  %v1883_v36 = vpop.f32.mrb[21].mxu0 }
 0x2bd   : > { %v1969_v55 = vmul.f32 %v3991_v46, %v1883_v36 }
 0x2be   : > { %v2009_v23 = vadd.f32 %v3998_v12, %v1970_v58 }
 0x2bf   : > { %v2008_v63 = vadd.f32 %v3998_v12, %v1969_v55 }
 0x2c0   : > { %vm2041_vm7 = vcmp.gt.f32.partialorder %v2009_v23, 0.0  ;;  %v2073_v45 = vmul.f32 0.1, %v2009_v23 }
 0x2c1   : > { %vm2040_vm8 = vcmp.gt.f32.partialorder %v2008_v63, 0.0  ;;  %v2072_v15 = vmul.f32 0.1, %v2008_v63 }
 0x2c2   : > { %v2105_v39 = vsel %vm2041_vm7, %v2009_v23, %v2073_v45 }
 0x2c3   : > { %v2104_v51 = vsel %vm2040_vm8, %v2008_v63, %v2072_v15 }
 0x2c4   : > { %v2509_v13 = vpack.c.bf16 %v2105_v39, %v2104_v51 }
 0x2c6   : > { %2510 = vmatprep.subr.bf16.mxu1 %v2509_v13 }
 0x2c7   : > { %2512 = vmatpush3.bf16.xpose.msra.mxu1 %v2511_v56  ;;  %v2119_v56 = vld [vmem:[%s4087_s5] sm:$0xff] }
 0x2c8   : > { %2124 = vperm.xlu0 %2568, %v2119_v56  }
 0x2db   : > { %v2480_v25 = vpop.f32.mrb[22].mxu0 }
 0x2dc   : > { %v1972_v20 = vmul.f32 %v3991_v46, %v2480_v25  ;;  %v1893_v43 = vpop.f32.mrb[23].mxu0 }
 0x2dd   : > { %v1971_v38 = vmul.f32 %v3991_v46, %v1893_v43 }
 0x2de   : > { %v2011_v53 = vadd.f32 %v3998_v12, %v1972_v20 }
 0x2df   : > { %v2010_v48 = vadd.f32 %v3998_v12, %v1971_v38 }
 0x2e0   : > { %vm2043_vm9 = vcmp.gt.f32.partialorder %v2011_v53, 0.0  ;;  %v2075_v24 = vmul.f32 0.1, %v2011_v53 }
 0x2e1   : > { %vm2042_vm10 = vcmp.gt.f32.partialorder %v2010_v48, 0.0  ;;  %v2074_v57 = vmul.f32 0.1, %v2010_v48 }
 0x2e2   : > { %v2107_v27 = vsel %vm2043_vm9, %v2011_v53, %v2075_v24 }
 0x2e3   : > { %v2106_v31 = vsel %vm2042_vm10, %v2010_v48, %v2074_v57 }
 0x2e4   : > { %v2513_v59 = vpack.c.bf16 %v2107_v27, %v2106_v31 }
 0x2e6   : > { %2514 = vmatprep.subr.bf16.mxu1 %v2513_v59 }
 0x2e7   : > { %2516 = vmatpush3.bf16.xpose.msra.mxu1 %v2515_v61 }
 0x2fa   : > { %v2483_v62 = vpop.f32.mrb[24].mxu0 }
 0x2fb   : > { %v1974_v10 = vmul.f32 %v3991_v46, %v2483_v62  ;;  %v1903_v61 = vpop.f32.mrb[25].mxu0 }
 0x2fc   : > { %v1973_v28 = vmul.f32 %v3991_v46, %v1903_v61 }
 0x2fd   : > { %v2013_v3 = vadd.f32 %v3998_v12, %v1974_v10 }
 0x2fe   : > { %v2012_v40 = vadd.f32 %v3998_v12, %v1973_v28 }
 0x2ff   : > { %vm2045_vm11 = vcmp.gt.f32.partialorder %v2013_v3, 0.0  ;;  %v2077_v8 = vmul.f32 0.1, %v2013_v3 }
 0x300   : > { %vm2044_vm15 = vcmp.gt.f32.partialorder %v2012_v40, 0.0  ;;  %v2076_v47 = vmul.f32 0.1, %v2012_v40 }
 0x301   : > { %v2109_v16 = vsel %vm2045_vm11, %v2013_v3, %v2077_v8 }
 0x302   : > { %v2108_v14 = vsel %vm2044_vm15, %v2012_v40, %v2076_v47 }
 0x303   : > { %v2517_v0 = vpack.c.bf16 %v2109_v16, %v2108_v14 }
 0x305   : > { %2518 = vmatprep.subr.bf16.mxu1 %v2517_v0 }
 0x306   : > { %2520 = vmatpush3.bf16.xpose.msra.mxu1 %v2519_v30 }
 0x31a   : > { %v2486_v5 = vpop.f32.mrb[26].mxu0 }
 0x31b   : > { %v1976_v18 = vmul.f32 %v3991_v46, %v2486_v5  ;;  %v1913_v19 = vpop.f32.mrb[27].mxu0 }
 0x31c   : > { %v1975_v22 = vmul.f32 %v3991_v46, %v1913_v19 }
 0x31d   : > { %v2015_v7 = vadd.f32 %v3998_v12, %v1976_v18 }
 0x31e   : > { %v2014_v60 = vadd.f32 %v3998_v12, %v1975_v22 }
 0x31f   : > { %vm2047_vm0 = vcmp.gt.f32.partialorder %v2015_v7, 0.0  ;;  %v2079_v32 = vmul.f32 0.1, %v2015_v7 }
 0x320   : > { %vm2046_vm2 = vcmp.gt.f32.partialorder %v2014_v60, 0.0  ;;  %v2078_v54 = vmul.f32 0.1, %v2014_v60 }
 0x321   : > { %v2111_v50 = vsel %vm2047_vm0, %v2015_v7, %v2079_v32 }
 0x322   : > { %v2110_v44 = vsel %vm2046_vm2, %v2014_v60, %v2078_v54 }
 0x323   : > { %v2521_v29 = vpack.c.bf16 %v2111_v50, %v2110_v44 }
 0x325   : > { %2522 = vmatprep.subr.bf16.mxu1 %v2521_v29 }
 0x326   : > { %2524 = vmatpush3.bf16.xpose.msra.mxu1 %v2523_v41 }
 0x33a   : > { %v2489_v4 = vpop.f32.mrb[28].mxu0 }
 0x33b   : > { %v1978_v2 = vmul.f32 %v3991_v46, %v2489_v4  ;;  %v1923_v30 = vpop.f32.mrb[29].mxu0 }
 0x33c   : > { %v1977_v9 = vmul.f32 %v3991_v46, %v1923_v30 }
 0x33d   : > { %v2017_v1 = vadd.f32 %v3998_v12, %v1978_v2 }
 0x33e   : > { %v2016_v58 = vadd.f32 %v3998_v12, %v1977_v9 }
 0x33f   : > { %vm2049_vm12 = vcmp.gt.f32.partialorder %v2017_v1, 0.0  ;;  %v2081_v36 = vmul.f32 0.1, %v2017_v1 }
 0x340   : > { %vm2048_vm13 = vcmp.gt.f32.partialorder %v2016_v58, 0.0  ;;  %v2080_v55 = vmul.f32 0.1, %v2016_v58 }
 0x341   : > { %v2113_v23 = vsel %vm2049_vm12, %v2017_v1, %v2081_v36 }
 0x342   : > { %v2112_v63 = vsel %vm2048_vm13, %v2016_v58, %v2080_v55 }
 0x343   : > { %v2525_v45 = vpack.c.bf16 %v2113_v23, %v2112_v63 }
 0x345   : > { %2526 = vmatprep.subr.bf16.mxu1 %v2525_v45 }
 0x346   : > { %2528 = vmatpush3.bf16.xpose.msra.mxu1 %v2527_v35 }
 0x347   : > { %v2125_v35 = vpop.permute.xlu0 %2124 }
 0x357   : > { %v2492_v6 = vpop.f32.mrb[30].mxu0 }
 0x358   : > { %v1980_v42 = vmul.f32 %v3991_v46, %v2492_v6  ;;  %v1933_v41 = vpop.f32.mrb[31].mxu0 }
 0x359   : > { %v1979_v15 = vmul.f32 %v3991_v46, %v1933_v41 }
 0x35a   : > { %v2019_v39 = vadd.f32 %v3998_v12, %v1980_v42 }
 0x35b   : > { %v2018_v51 = vadd.f32 %v3998_v12, %v1979_v15 }
 0x35c   : > { %vm2051_vm14 = vcmp.gt.f32.partialorder %v2019_v39, 0.0  ;;  %v2083_v13 = vmul.f32 0.1, %v2019_v39 }
 0x35d   : > { %vm2050_vm1 = vcmp.gt.f32.partialorder %v2018_v51, 0.0  ;;  %v2082_v25 = vmul.f32 0.1, %v2018_v51 }
 0x35e   : > { %v2115_v20 = vsel %vm2051_vm14, %v2019_v39, %v2083_v13 }
 0x35f   : > { %v2114_v43 = vsel %vm2050_vm1, %v2018_v51, %v2082_v25 }
 0x360   : > { %v2529_v38 = vpack.c.bf16 %v2115_v20, %v2114_v43 }
 0x362   : > { %2530 = vmatprep.subr.bf16.mxu1 %v2529_v38 }
 0x363   : > { %2532 = vmatpush3.bf16.xpose.msra.mxu1 %v2531_v17  ;;  %v2130_v17 = vpop.permute.xlu1 %2129 }
 0x367   : > { %v2135_v27 = vpop.permute.xlu1 %2134 }
 0x36a   : > { %2430 = vmatmul.mubr.f32.vlgmr.msra.gmra.mrb[0].mxu1 %v4019_v33 }
 0x36b   : > { %2431 = vmatprep.mubr.f32.mxu1 %v2117_v52 }
 0x36e   : > { %2432 = vmatmul.mubr.f32.gmra.mrb[2].mxu1 %v2117_v52 }
 0x36f   : > { %2433 = vmatprep.mubr.f32.mxu1 %v2118_v21 }
 0x372   : > { %2434 = vmatmul.mubr.f32.gmra.mrb[4].mxu1 %v2118_v21 }
 0x43d   : > { %v2203_v46 = vpop.f32.mrb[0].mxu1 }
 0x43e   : > { %v2204_v34 = vadd.f32 %v2203_v46, %v2125_v35  ;;  %v2205_v37 = vpop.f32.mrb[1].mxu1 }
 0x43f   : > { %v2206_v12 = vadd.f32 %v2205_v37, %v2125_v35 }
 0x440   : > { %2220 = vst [vmem:[%s287_s12] sm:$0xff] %v2204_v34 }
 0x441   : > { %2221 = vst [vmem:[%s287_s12 + $0x8] sm:$0xff] %v2206_v12  ;;  %v2209_v53 = vpop.f32.mrb[2].mxu1 }
 0x442   : > { %v2210_v48 = vadd.f32 %v2209_v53, %v2130_v17  ;;  %v2211_v24 = vpop.f32.mrb[3].mxu1 }
 0x443   : > { %v2212_v57 = vadd.f32 %v2211_v24, %v2130_v17 }
 0x444   : > { %2222 = vst [vmem:[%s287_s12 + $0x10] sm:$0xff] %v2210_v48 }
 0x445   : > { %2223 = vst [vmem:[%s287_s12 + $0x18] sm:$0xff] %v2212_v57  ;;  %v2215_v31 = vpop.f32.mrb[4].mxu1 }
 0x446   : > { %v2216_v33 = vadd.f32 %v2215_v31, %v2135_v27  ;;  %v2217_v59 = vpop.f32.mrb[5].mxu1 }
 0x447   : > { %v2218_v56 = vadd.f32 %v2217_v59, %v2135_v27 }
 0x448   : > { %2224 = vst [vmem:[%s287_s12 + $0x20] sm:$0x3] %v2216_v33 }
 0x449   : > { %2225 = vst [vmem:[%s287_s12 + $0x28] sm:$0x3] %v2218_v56 }
 0x44a PF: > { %s16_s23 = sadd.s32 1, %s2594_s23   ;;  %s4089_s21 = smov %s2590_s22 }
 0x44b   : > { %p13_p5 = scmp.ge.s32.totalorder %s16_s23, 4   ;;  %s4090_s22 = smov %s4092_s24 }
 0x44d   :  { %15 = sbr.rel (!%p13_p5) target bundleno = 2 (0x2), region = 74 }

</bundles_post_ra>
